<compile_context>
chip_gen: v5e
topology: v5e:2x2
jax: 0.10.0
libtpu: 0.0.40
codegen_flags: <defaults>
</compile_context>

<pallas_src>
import functools

import jax
import jax.numpy as jnp
from jax import lax
from jax.experimental import pallas as pl
from jax.experimental.pallas import tpu as pltpu

LEAKY_SLOPE = 0.01  # PyTorch nn.LeakyReLU default
K1PAD = 32          # conv1 im2col K (27) padded to a power-of-two sublane-friendly size
TK_FC_MAX = 2048    # max K tile for the FC reduction grid


def _conv_out(size, k=3, s=2):
    return (size - (k - 1) - 1) // s + 1


def _ceil_to(x, m):
    return ((x + m - 1) // m) * m


def _leaky(v):
    return jnp.where(v >= 0.0, v, LEAKY_SLOPE * v)


# --------------------------- Pallas kernel bodies --------------------------- #
def _fused_conv_kernel(p1_ref, w1_ref, b1_ref, w2_ref, b2_ref, o_ref, y1_scr,
                       *, HP, WP, Ho2, Wo2):
    """Per-image fused conv1+LeakyReLU+conv2+LeakyReLU.

    p1_ref : (1, 4, HP*WP, K1PAD) bf16  phase-grouped conv1 im2col patches
    w1_ref : (K1PAD, 32) bf16           conv1 weight matrix
    b1_ref : (1, 32) f32
    w2_ref : (9, 32, 64) bf16           conv2 taps, index ky*3+kx
    b2_ref : (1, 64) f32
    o_ref  : (1, Ho2, Wo2, 64) f32      conv2 output (NHWC)
    y1_scr : (4, HP*WP, 32) f32         conv1 output, phase-split, VMEM-resident
    """
    # conv1 + LeakyReLU: one MXU matmul per spatial phase of the conv1 output.
    for ph in range(4):
        patches = p1_ref[0, ph, :, :]                              # (HP*WP, K1PAD) bf16
        acc = jnp.dot(patches, w1_ref[...],
                      preferred_element_type=jnp.float32)          # (HP*WP, 32) f32
        y1_scr[ph, :, :] = _leaky(acc + b1_ref[...])

    # conv2 + LeakyReLU: for each output row, accumulate 9 shifted contiguous
    # slices of the phase-split y1 (all slice offsets are static).
    for c in range(Ho2):
        acc = jnp.zeros((Wo2, 64), jnp.float32)
        for ky in range(3):
            for kx in range(3):
                ph = (ky % 2) * 2 + (kx % 2)
                off = (c + ky // 2) * WP + kx // 2
                xs = y1_scr[ph, off:off + Wo2, :].astype(jnp.bfloat16)   # (Wo2, 32)
                acc = acc + jnp.dot(xs, w2_ref[ky * 3 + kx],
                                    preferred_element_type=jnp.float32)
        o_ref[0, c, :, :] = _leaky(acc + b2_ref[...])


def _fc_softmax_kernel(x_ref, w_ref, b_ref, o_ref, acc_ref):
    """K-tiled Linear + Softmax.  x:(B,TK) bf16, w:(TK,A) bf16, b:(1,A) f32."""
    k = pl.program_id(0)

    @pl.when(k == 0)
    def _init():
        acc_ref[...] = jnp.zeros_like(acc_ref)

    acc_ref[...] += jnp.dot(x_ref[...], w_ref[...],
                            preferred_element_type=jnp.float32)

    @pl.when(k == pl.num_programs(0) - 1)
    def _finalize():
        logits = acc_ref[...] + b_ref[...]
        m = jnp.max(logits, axis=-1, keepdims=True)
        e = jnp.exp(logits - m)
        denom = jnp.sum(e, axis=-1, keepdims=True)
        o_ref[...] = e * pl.reciprocal(denom, approx=True)


# ------------------------------ wrapper (glue) ------------------------------ #
def _im2col_nhwc(x):
    """x: (B, H, W, C) -> patches (B, Ho, Wo, 9*C) ordered (ky, kx, c_in)."""
    B, H, W, C = x.shape
    Ho, Wo = _conv_out(H), _conv_out(W)
    cols = []
    for ky in range(3):
        for kx in range(3):
            cols.append(x[:, ky:ky + 2 * Ho:2, kx:kx + 2 * Wo:2, :])
    return jnp.concatenate(cols, axis=-1), Ho, Wo


def init_actor_params(key, h, w, action_dim):
    k1, k2, k3, k4, k5, k6 = jax.random.split(key, 6)
    convw = _conv_out(_conv_out(w))
    convh = _conv_out(_conv_out(h))
    linear_input_size = convw * convh * 64
    # NOTE: fc_w is stored (in, out) = transpose of PyTorch nn.Linear.weight.
    return {
        "conv1_w": jax.random.normal(k1, (32, 3, 3, 3), jnp.float32) * 0.05,
        "conv1_b": jax.random.normal(k2, (32,), jnp.float32) * 0.05,
        "conv2_w": jax.random.normal(k3, (64, 32, 3, 3), jnp.float32) * 0.05,
        "conv2_b": jax.random.normal(k4, (64,), jnp.float32) * 0.05,
        "fc_w": jax.random.normal(k5, (linear_input_size, action_dim), jnp.float32) * 0.02,
        "fc_b": jax.random.normal(k6, (action_dim,), jnp.float32) * 0.02,
    }


@jax.jit
def actor_forward(params, state_nchw):
    """state: (B, 3, H, W) float32 -> action probabilities (B, action_dim)."""
    B, _, H, W = state_nchw.shape
    x = jnp.transpose(state_nchw, (0, 2, 3, 1)).astype(jnp.float32)   # NHWC

    # ---- conv1 patches, phase-grouped by conv1 output parity (wrapper glue) ----
    p1, Ho1, Wo1 = _im2col_nhwc(x)                  # (B, Ho1, Wo1, 27)
    K1 = p1.shape[-1]
    HP, WP = (Ho1 + 1) // 2, (Wo1 + 1) // 2
    Ho2, Wo2 = _conv_out(Ho1), _conv_out(Wo1)
    p1 = jnp.pad(p1, ((0, 0), (0, 2 * HP - Ho1), (0, 2 * WP - Wo1), (0, K1PAD - K1)))
    p1 = p1.reshape(B, HP, 2, WP, 2, K1PAD).transpose(0, 2, 4, 1, 3, 5)
    p1g = p1.reshape(B, 4, HP * WP, K1PAD).astype(jnp.bfloat16)

    # conv weights -> matmul form (bf16), biases stay f32
    w1m = jnp.transpose(params["conv1_w"], (2, 3, 1, 0)).reshape(K1, 32)
    w1m = jnp.pad(w1m, ((0, K1PAD - K1), (0, 0))).astype(jnp.bfloat16)
    b1 = params["conv1_b"].reshape(1, 32).astype(jnp.float32)
    w2s = jnp.transpose(params["conv2_w"], (2, 3, 1, 0)).reshape(9, 32, 64).astype(jnp.bfloat16)
    b2 = params["conv2_b"].reshape(1, 64).astype(jnp.float32)

    kernel1 = functools.partial(_fused_conv_kernel, HP=HP, WP=WP, Ho2=Ho2, Wo2=Wo2)
    y2 = pl.pallas_call(
        kernel1,
        out_shape=jax.ShapeDtypeStruct((B, Ho2, Wo2, 64), jnp.float32),
        grid=(B,),
        in_specs=[
            pl.BlockSpec((1, 4, HP * WP, K1PAD), lambda b: (b, 0, 0, 0)),
            pl.BlockSpec((K1PAD, 32), lambda b: (0, 0)),
            pl.BlockSpec((1, 32), lambda b: (0, 0)),
            pl.BlockSpec((9, 32, 64), lambda b: (0, 0, 0)),
            pl.BlockSpec((1, 64), lambda b: (0, 0)),
        ],
        out_specs=pl.BlockSpec((1, Ho2, Wo2, 64), lambda b: (b, 0, 0, 0)),
        scratch_shapes=[pltpu.VMEM((4, HP * WP, 32), jnp.float32)],
        compiler_params=pltpu.CompilerParams(
            dimension_semantics=("parallel",),
            vmem_limit_bytes=64 * 1024 * 1024),
    )(p1g, w1m, b1, w2s, b2)

    # ---- flatten + FC + softmax ----
    S2 = Ho2 * Wo2
    F = S2 * 64
    A = params["fc_w"].shape[1]
    # Permute FC weight rows so the NHWC flatten of y2 matches PyTorch's
    # (C, H, W) flatten order — weight-side glue instead of transposing y2.
    fcw = params["fc_w"].reshape(64, Ho2, Wo2, A).transpose(1, 2, 0, 3).reshape(F, A)
    TK = min(_ceil_to(F, 128), TK_FC_MAX)
    Fp = _ceil_to(F, TK)
    flat = jnp.pad(y2.reshape(B, F), ((0, 0), (0, Fp - F))).astype(jnp.bfloat16)
    fcw = jnp.pad(fcw, ((0, Fp - F), (0, 0))).astype(jnp.bfloat16)
    fcb = params["fc_b"].reshape(1, A).astype(jnp.float32)
    kt = Fp // TK

    probs = pl.pallas_call(
        _fc_softmax_kernel,
        out_shape=jax.ShapeDtypeStruct((B, A), jnp.float32),
        grid=(kt,),
        in_specs=[
            pl.BlockSpec((B, TK), lambda k: (0, k)),
            pl.BlockSpec((TK, A), lambda k: (k, 0)),
            pl.BlockSpec((1, A), lambda k: (0, 0)),
        ],
        out_specs=pl.BlockSpec((B, A), lambda k: (0, 0)),
        scratch_shapes=[pltpu.VMEM((B, A), jnp.float32)],
        compiler_params=pltpu.CompilerParams(
            dimension_semantics=("arbitrary",),
            vmem_limit_bytes=64 * 1024 * 1024),
    )(flat, fcw, fcb)
    return probs


# ------------------------- pure-JAX reference (check) ----------------------- #
def _reference_forward(params, state):
    x = state.astype(jnp.float32)
    y = lax.conv_general_dilated(x, params["conv1_w"], (2, 2), "VALID",
                                 dimension_numbers=("NCHW", "OIHW", "NCHW"))
    y = jnp.where(y >= 0, y, LEAKY_SLOPE * y)
    y = lax.conv_general_dilated(y, params["conv2_w"], (2, 2), "VALID",
                                 dimension_numbers=("NCHW", "OIHW", "NCHW"))
    y = jnp.where(y >= 0, y, LEAKY_SLOPE * y)
    flat = y.reshape(y.shape[0], -1)               # PyTorch (C, H, W) flatten
    logits = flat @ params["fc_w"] + params["fc_b"]
    return jax.nn.softmax(logits, axis=-1)


if __name__ == "__main__":
    # Small shapes consistent with the module (3-channel NCHW input, two s=2 convs).
    B, C, H, W = 2, 3, 16, 16
    action_dim = 4

    key = jax.random.PRNGKey(0)
    pkey, xkey = jax.random.split(key)
    params = init_actor_params(pkey, H, W, action_dim)
    state = jax.random.normal(xkey, (B, C, H, W), jnp.float32)

    probs = jax.block_until_ready(actor_forward(params, state))

    assert probs.shape == (B, action_dim)
    # softmax rows sum to ~1 (approx reciprocal -> allow ~1e-3 deviation)
    assert bool(jnp.all(jnp.abs(jnp.sum(probs, axis=-1) - 1.0) < 5e-3))
    # match the pure-JAX/XLA reference (bf16 matmul operands -> loose atol)
    ref = _reference_forward(params, state)
    assert bool(jnp.max(jnp.abs(probs - ref)) < 3e-2)
    print("KERNEL_OK")
</pallas_src>

<mosaic_0001>
module attributes {stable_mosaic.version = 11 : i64} {
  func.func @_fused_conv_kernel(%arg0: i32, %arg1: memref<1x4x16x32xbf16, #tpu.memory_space<vmem>>, %arg2: memref<32x32xbf16, #tpu.memory_space<vmem>>, %arg3: memref<1x32xf32, #tpu.memory_space<vmem>>, %arg4: memref<9x32x64xbf16, #tpu.memory_space<vmem>>, %arg5: memref<1x64xf32, #tpu.memory_space<vmem>>, %arg6: memref<1x3x3x64xf32, #tpu.memory_space<vmem>>, %arg7: memref<4x16x32xf32, #tpu.memory_space<vmem>>) attributes {dimension_semantics = [#tpu.dimension_semantics<parallel>], iteration_bounds = array<i64: 2>, scalar_prefetch = 0 : i64, scratch_operands = 1 : i64, tpu.core_type = #tpu.core_type<tc>, window_params = [{transform_indices = @transform_0, window_bounds = array<i64: 1, 4, 16, 32>}, {pipeline_mode = #tpu.pipeline_mode<synchronous>, transform_indices = @transform_1, window_bounds = array<i64: 32, 32>}, {pipeline_mode = #tpu.pipeline_mode<synchronous>, transform_indices = @transform_2, window_bounds = array<i64: 1, 32>}, {pipeline_mode = #tpu.pipeline_mode<synchronous>, transform_indices = @transform_3, window_bounds = array<i64: 9, 32, 64>}, {pipeline_mode = #tpu.pipeline_mode<synchronous>, transform_indices = @transform_4, window_bounds = array<i64: 1, 64>}, {transform_indices = @transform_5, window_bounds = array<i64: 1, 3, 3, 64>}]} {
    %c0 = arith.constant 0 : index
    %c0_0 = arith.constant 0 : index
    %c0_1 = arith.constant 0 : index
    %c0_2 = arith.constant 0 : index
    %0 = vector.load %arg1[%c0, %c0_0, %c0_1, %c0_2] : memref<1x4x16x32xbf16, #tpu.memory_space<vmem>>, vector<1x1x16x32xbf16>
    %1 = vector.shape_cast %0 : vector<1x1x16x32xbf16> to vector<16x32xbf16>
    %c0_3 = arith.constant 0 : index
    %c0_4 = arith.constant 0 : index
    %2 = vector.load %arg2[%c0_3, %c0_4] : memref<32x32xbf16, #tpu.memory_space<vmem>>, vector<32x32xbf16>
    %cst = arith.constant dense<0.000000e+00> : vector<16x32xf32>
    %3 = tpu.matmul %1, %2, %cst {dimension_numbers = #tpu.dot_dimension_numbers<[1], [0], [0], [1], [0, 0, 1, 1], [], []>} : vector<16x32xbf16>, vector<32x32xbf16>, vector<16x32xf32> -> vector<16x32xf32>
    %c0_5 = arith.constant 0 : index
    %c0_6 = arith.constant 0 : index
    %4 = vector.load %arg3[%c0_5, %c0_6] : memref<1x32xf32, #tpu.memory_space<vmem>>, vector<1x32xf32>
    %5 = vector.broadcast %4 : vector<1x32xf32> to vector<16x32xf32>
    %6 = arith.addf %3, %5 : vector<16x32xf32>
    %cst_7 = arith.constant 0.000000e+00 : f32
    %7 = vector.broadcast %cst_7 : f32 to vector<16x32xf32>
    %8 = arith.cmpf oge, %6, %7 : vector<16x32xf32>
    %cst_8 = arith.constant 0.00999999977 : f32
    %9 = vector.broadcast %cst_8 : f32 to vector<16x32xf32>
    %10 = arith.mulf %9, %6 : vector<16x32xf32>
    %11 = arith.select %8, %6, %10 : vector<16x32xi1>, vector<16x32xf32>
    %c0_9 = arith.constant 0 : index
    %c0_10 = arith.constant 0 : index
    %c0_11 = arith.constant 0 : index
    %12 = vector.load %arg7[%c0_9, %c0_10, %c0_11] : memref<4x16x32xf32, #tpu.memory_space<vmem>>, vector<1x16x32xf32>
    %13 = vector.shape_cast %12 : vector<1x16x32xf32> to vector<16x32xf32>
    %14 = vector.shape_cast %11 : vector<16x32xf32> to vector<1x16x32xf32>
    tpu.vector_store %arg7[%c0_9, %c0_10, %c0_11], %14 {strides = array<i32>} : memref<4x16x32xf32, #tpu.memory_space<vmem>>, vector<1x16x32xf32>,
    %c0_12 = arith.constant 0 : index
    %c1 = arith.constant 1 : index
    %c0_13 = arith.constant 0 : index
    %c0_14 = arith.constant 0 : index
    %15 = vector.load %arg1[%c0_12, %c1, %c0_13, %c0_14] : memref<1x4x16x32xbf16, #tpu.memory_space<vmem>>, vector<1x1x16x32xbf16>
    %16 = vector.shape_cast %15 : vector<1x1x16x32xbf16> to vector<16x32xbf16>
    %c0_15 = arith.constant 0 : index
    %c0_16 = arith.constant 0 : index
    %17 = vector.load %arg2[%c0_15, %c0_16] : memref<32x32xbf16, #tpu.memory_space<vmem>>, vector<32x32xbf16>
    %cst_17 = arith.constant dense<0.000000e+00> : vector<16x32xf32>
    %18 = tpu.matmul %16, %17, %cst_17 {dimension_numbers = #tpu.dot_dimension_numbers<[1], [0], [0], [1], [0, 0, 1, 1], [], []>} : vector<16x32xbf16>, vector<32x32xbf16>, vector<16x32xf32> -> vector<16x32xf32>
    %c0_18 = arith.constant 0 : index
    %c0_19 = arith.constant 0 : index
    %19 = vector.load %arg3[%c0_18, %c0_19] : memref<1x32xf32, #tpu.memory_space<vmem>>, vector<1x32xf32>
    %20 = vector.broadcast %19 : vector<1x32xf32> to vector<16x32xf32>
    %21 = arith.addf %18, %20 : vector<16x32xf32>
    %cst_20 = arith.constant 0.000000e+00 : f32
    %22 = vector.broadcast %cst_20 : f32 to vector<16x32xf32>
    %23 = arith.cmpf oge, %21, %22 : vector<16x32xf32>
    %cst_21 = arith.constant 0.00999999977 : f32
    %24 = vector.broadcast %cst_21 : f32 to vector<16x32xf32>
    %25 = arith.mulf %24, %21 : vector<16x32xf32>
    %26 = arith.select %23, %21, %25 : vector<16x32xi1>, vector<16x32xf32>
    %c1_22 = arith.constant 1 : index
    %c0_23 = arith.constant 0 : index
    %c0_24 = arith.constant 0 : index
    %27 = vector.load %arg7[%c1_22, %c0_23, %c0_24] : memref<4x16x32xf32, #tpu.memory_space<vmem>>, vector<1x16x32xf32>
    %28 = vector.shape_cast %27 : vector<1x16x32xf32> to vector<16x32xf32>
    %29 = vector.shape_cast %26 : vector<16x32xf32> to vector<1x16x32xf32>
    tpu.vector_store %arg7[%c1_22, %c0_23, %c0_24], %29 {strides = array<i32>} : memref<4x16x32xf32, #tpu.memory_space<vmem>>, vector<1x16x32xf32>,
    %c0_25 = arith.constant 0 : index
    %c2 = arith.constant 2 : index
    %c0_26 = arith.constant 0 : index
    %c0_27 = arith.constant 0 : index
    %30 = vector.load %arg1[%c0_25, %c2, %c0_26, %c0_27] : memref<1x4x16x32xbf16, #tpu.memory_space<vmem>>, vector<1x1x16x32xbf16>
    %31 = vector.shape_cast %30 : vector<1x1x16x32xbf16> to vector<16x32xbf16>
    %c0_28 = arith.constant 0 : index
    %c0_29 = arith.constant 0 : index
    %32 = vector.load %arg2[%c0_28, %c0_29] : memref<32x32xbf16, #tpu.memory_space<vmem>>, vector<32x32xbf16>
    %cst_30 = arith.constant dense<0.000000e+00> : vector<16x32xf32>
    %33 = tpu.matmul %31, %32, %cst_30 {dimension_numbers = #tpu.dot_dimension_numbers<[1], [0], [0], [1], [0, 0, 1, 1], [], []>} : vector<16x32xbf16>, vector<32x32xbf16>, vector<16x32xf32> -> vector<16x32xf32>
    %c0_31 = arith.constant 0 : index
    %c0_32 = arith.constant 0 : index
    %34 = vector.load %arg3[%c0_31, %c0_32] : memref<1x32xf32, #tpu.memory_space<vmem>>, vector<1x32xf32>
    %35 = vector.broadcast %34 : vector<1x32xf32> to vector<16x32xf32>
    %36 = arith.addf %33, %35 : vector<16x32xf32>
    %cst_33 = arith.constant 0.000000e+00 : f32
    %37 = vector.broadcast %cst_33 : f32 to vector<16x32xf32>
    %38 = arith.cmpf oge, %36, %37 : vector<16x32xf32>
    %cst_34 = arith.constant 0.00999999977 : f32
    %39 = vector.broadcast %cst_34 : f32 to vector<16x32xf32>
    %40 = arith.mulf %39, %36 : vector<16x32xf32>
    %41 = arith.select %38, %36, %40 : vector<16x32xi1>, vector<16x32xf32>
    %c2_35 = arith.constant 2 : index
    %c0_36 = arith.constant 0 : index
    %c0_37 = arith.constant 0 : index
    %42 = vector.load %arg7[%c2_35, %c0_36, %c0_37] : memref<4x16x32xf32, #tpu.memory_space<vmem>>, vector<1x16x32xf32>
    %43 = vector.shape_cast %42 : vector<1x16x32xf32> to vector<16x32xf32>
    %44 = vector.shape_cast %41 : vector<16x32xf32> to vector<1x16x32xf32>
    tpu.vector_store %arg7[%c2_35, %c0_36, %c0_37], %44 {strides = array<i32>} : memref<4x16x32xf32, #tpu.memory_space<vmem>>, vector<1x16x32xf32>,
    %c0_38 = arith.constant 0 : index
    %c3 = arith.constant 3 : index
    %c0_39 = arith.constant 0 : index
    %c0_40 = arith.constant 0 : index
    %45 = vector.load %arg1[%c0_38, %c3, %c0_39, %c0_40] : memref<1x4x16x32xbf16, #tpu.memory_space<vmem>>, vector<1x1x16x32xbf16>
    %46 = vector.shape_cast %45 : vector<1x1x16x32xbf16> to vector<16x32xbf16>
    %c0_41 = arith.constant 0 : index
    %c0_42 = arith.constant 0 : index
    %47 = vector.load %arg2[%c0_41, %c0_42] : memref<32x32xbf16, #tpu.memory_space<vmem>>, vector<32x32xbf16>
    %cst_43 = arith.constant dense<0.000000e+00> : vector<16x32xf32>
    %48 = tpu.matmul %46, %47, %cst_43 {dimension_numbers = #tpu.dot_dimension_numbers<[1], [0], [0], [1], [0, 0, 1, 1], [], []>} : vector<16x32xbf16>, vector<32x32xbf16>, vector<16x32xf32> -> vector<16x32xf32>
    %c0_44 = arith.constant 0 : index
    %c0_45 = arith.constant 0 : index
    %49 = vector.load %arg3[%c0_44, %c0_45] : memref<1x32xf32, #tpu.memory_space<vmem>>, vector<1x32xf32>
    %50 = vector.broadcast %49 : vector<1x32xf32> to vector<16x32xf32>
    %51 = arith.addf %48, %50 : vector<16x32xf32>
    %cst_46 = arith.constant 0.000000e+00 : f32
    %52 = vector.broadcast %cst_46 : f32 to vector<16x32xf32>
    %53 = arith.cmpf oge, %51, %52 : vector<16x32xf32>
    %cst_47 = arith.constant 0.00999999977 : f32
    %54 = vector.broadcast %cst_47 : f32 to vector<16x32xf32>
    %55 = arith.mulf %54, %51 : vector<16x32xf32>
    %56 = arith.select %53, %51, %55 : vector<16x32xi1>, vector<16x32xf32>
    %c3_48 = arith.constant 3 : index
    %c0_49 = arith.constant 0 : index
    %c0_50 = arith.constant 0 : index
    %57 = vector.load %arg7[%c3_48, %c0_49, %c0_50] : memref<4x16x32xf32, #tpu.memory_space<vmem>>, vector<1x16x32xf32>
    %58 = vector.shape_cast %57 : vector<1x16x32xf32> to vector<16x32xf32>
    %59 = vector.shape_cast %56 : vector<16x32xf32> to vector<1x16x32xf32>
    tpu.vector_store %arg7[%c3_48, %c0_49, %c0_50], %59 {strides = array<i32>} : memref<4x16x32xf32, #tpu.memory_space<vmem>>, vector<1x16x32xf32>,
    %cst_51 = arith.constant 0.000000e+00 : f32
    %60 = vector.broadcast %cst_51 : f32 to vector<3x64xf32>
    %c0_52 = arith.constant 0 : index
    %c0_53 = arith.constant 0 : index
    %c0_54 = arith.constant 0 : index
    %61 = vector.load %arg7[%c0_52, %c0_53, %c0_54] : memref<4x16x32xf32, #tpu.memory_space<vmem>>, vector<1x3x32xf32>
    %62 = vector.shape_cast %61 : vector<1x3x32xf32> to vector<3x32xf32>
    %63 = arith.truncf %62 : vector<3x32xf32> to vector<3x32xbf16>
    %c0_55 = arith.constant 0 : index
    %c0_56 = arith.constant 0 : index
    %c0_57 = arith.constant 0 : index
    %64 = vector.load %arg4[%c0_55, %c0_56, %c0_57] : memref<9x32x64xbf16, #tpu.memory_space<vmem>>, vector<1x32x64xbf16>
    %65 = vector.shape_cast %64 : vector<1x32x64xbf16> to vector<32x64xbf16>
    %cst_58 = arith.constant dense<0.000000e+00> : vector<3x64xf32>
    %66 = tpu.matmul %63, %65, %cst_58 {dimension_numbers = #tpu.dot_dimension_numbers<[1], [0], [0], [1], [0, 0, 1, 1], [], []>} : vector<3x32xbf16>, vector<32x64xbf16>, vector<3x64xf32> -> vector<3x64xf32>
    %67 = arith.addf %60, %66 : vector<3x64xf32>
    %c1_59 = arith.constant 1 : index
    %c0_60 = arith.constant 0 : index
    %c0_61 = arith.constant 0 : index
    %68 = vector.load %arg7[%c1_59, %c0_60, %c0_61] : memref<4x16x32xf32, #tpu.memory_space<vmem>>, vector<1x3x32xf32>
    %69 = vector.shape_cast %68 : vector<1x3x32xf32> to vector<3x32xf32>
    %70 = arith.truncf %69 : vector<3x32xf32> to vector<3x32xbf16>
    %c1_62 = arith.constant 1 : index
    %c0_63 = arith.constant 0 : index
    %c0_64 = arith.constant 0 : index
    %71 = vector.load %arg4[%c1_62, %c0_63, %c0_64] : memref<9x32x64xbf16, #tpu.memory_space<vmem>>, vector<1x32x64xbf16>
    %72 = vector.shape_cast %71 : vector<1x32x64xbf16> to vector<32x64xbf16>
    %cst_65 = arith.constant dense<0.000000e+00> : vector<3x64xf32>
    %73 = tpu.matmul %70, %72, %cst_65 {dimension_numbers = #tpu.dot_dimension_numbers<[1], [0], [0], [1], [0, 0, 1, 1], [], []>} : vector<3x32xbf16>, vector<32x64xbf16>, vector<3x64xf32> -> vector<3x64xf32>
    %74 = arith.addf %67, %73 : vector<3x64xf32>
    %c0_66 = arith.constant 0 : index
    %c1_67 = arith.constant 1 : index
    %c0_68 = arith.constant 0 : index
    %75 = vector.load %arg7[%c0_66, %c1_67, %c0_68] : memref<4x16x32xf32, #tpu.memory_space<vmem>>, vector<1x3x32xf32>
    %76 = vector.shape_cast %75 : vector<1x3x32xf32> to vector<3x32xf32>
    %77 = arith.truncf %76 : vector<3x32xf32> to vector<3x32xbf16>
    %c2_69 = arith.constant 2 : index
    %c0_70 = arith.constant 0 : index
    %c0_71 = arith.constant 0 : index
    %78 = vector.load %arg4[%c2_69, %c0_70, %c0_71] : memref<9x32x64xbf16, #tpu.memory_space<vmem>>, vector<1x32x64xbf16>
    %79 = vector.shape_cast %78 : vector<1x32x64xbf16> to vector<32x64xbf16>
    %cst_72 = arith.constant dense<0.000000e+00> : vector<3x64xf32>
    %80 = tpu.matmul %77, %79, %cst_72 {dimension_numbers = #tpu.dot_dimension_numbers<[1], [0], [0], [1], [0, 0, 1, 1], [], []>} : vector<3x32xbf16>, vector<32x64xbf16>, vector<3x64xf32> -> vector<3x64xf32>
    %81 = arith.addf %74, %80 : vector<3x64xf32>
    %c2_73 = arith.constant 2 : index
    %c0_74 = arith.constant 0 : index
    %c0_75 = arith.constant 0 : index
    %82 = vector.load %arg7[%c2_73, %c0_74, %c0_75] : memref<4x16x32xf32, #tpu.memory_space<vmem>>, vector<1x3x32xf32>
    %83 = vector.shape_cast %82 : vector<1x3x32xf32> to vector<3x32xf32>
    %84 = arith.truncf %83 : vector<3x32xf32> to vector<3x32xbf16>
    %c3_76 = arith.constant 3 : index
    %c0_77 = arith.constant 0 : index
    %c0_78 = arith.constant 0 : index
    %85 = vector.load %arg4[%c3_76, %c0_77, %c0_78] : memref<9x32x64xbf16, #tpu.memory_space<vmem>>, vector<1x32x64xbf16>
    %86 = vector.shape_cast %85 : vector<1x32x64xbf16> to vector<32x64xbf16>
    %cst_79 = arith.constant dense<0.000000e+00> : vector<3x64xf32>
    %87 = tpu.matmul %84, %86, %cst_79 {dimension_numbers = #tpu.dot_dimension_numbers<[1], [0], [0], [1], [0, 0, 1, 1], [], []>} : vector<3x32xbf16>, vector<32x64xbf16>, vector<3x64xf32> -> vector<3x64xf32>
    %88 = arith.addf %81, %87 : vector<3x64xf32>
    %c3_80 = arith.constant 3 : index
    %c0_81 = arith.constant 0 : index
    %c0_82 = arith.constant 0 : index
    %89 = vector.load %arg7[%c3_80, %c0_81, %c0_82] : memref<4x16x32xf32, #tpu.memory_space<vmem>>, vector<1x3x32xf32>
    %90 = vector.shape_cast %89 : vector<1x3x32xf32> to vector<3x32xf32>
    %91 = arith.truncf %90 : vector<3x32xf32> to vector<3x32xbf16>
    %c4 = arith.constant 4 : index
    %c0_83 = arith.constant 0 : index
    %c0_84 = arith.constant 0 : index
    %92 = vector.load %arg4[%c4, %c0_83, %c0_84] : memref<9x32x64xbf16, #tpu.memory_space<vmem>>, vector<1x32x64xbf16>
    %93 = vector.shape_cast %92 : vector<1x32x64xbf16> to vector<32x64xbf16>
    %cst_85 = arith.constant dense<0.000000e+00> : vector<3x64xf32>
    %94 = tpu.matmul %91, %93, %cst_85 {dimension_numbers = #tpu.dot_dimension_numbers<[1], [0], [0], [1], [0, 0, 1, 1], [], []>} : vector<3x32xbf16>, vector<32x64xbf16>, vector<3x64xf32> -> vector<3x64xf32>
    %95 = arith.addf %88, %94 : vector<3x64xf32>
    %c2_86 = arith.constant 2 : index
    %c1_87 = arith.constant 1 : index
    %c0_88 = arith.constant 0 : index
    %96 = vector.load %arg7[%c2_86, %c1_87, %c0_88] : memref<4x16x32xf32, #tpu.memory_space<vmem>>, vector<1x3x32xf32>
    %97 = vector.shape_cast %96 : vector<1x3x32xf32> to vector<3x32xf32>
    %98 = arith.truncf %97 : vector<3x32xf32> to vector<3x32xbf16>
    %c5 = arith.constant 5 : index
    %c0_89 = arith.constant 0 : index
    %c0_90 = arith.constant 0 : index
    %99 = vector.load %arg4[%c5, %c0_89, %c0_90] : memref<9x32x64xbf16, #tpu.memory_space<vmem>>, vector<1x32x64xbf16>
    %100 = vector.shape_cast %99 : vector<1x32x64xbf16> to vector<32x64xbf16>
    %cst_91 = arith.constant dense<0.000000e+00> : vector<3x64xf32>
    %101 = tpu.matmul %98, %100, %cst_91 {dimension_numbers = #tpu.dot_dimension_numbers<[1], [0], [0], [1], [0, 0, 1, 1], [], []>} : vector<3x32xbf16>, vector<32x64xbf16>, vector<3x64xf32> -> vector<3x64xf32>
    %102 = arith.addf %95, %101 : vector<3x64xf32>
    %c0_92 = arith.constant 0 : index
    %c4_93 = arith.constant 4 : index
    %c0_94 = arith.constant 0 : index
    %103 = vector.load %arg7[%c0_92, %c4_93, %c0_94] : memref<4x16x32xf32, #tpu.memory_space<vmem>>, vector<1x3x32xf32>
    %104 = vector.shape_cast %103 : vector<1x3x32xf32> to vector<3x32xf32>
    %105 = arith.truncf %104 : vector<3x32xf32> to vector<3x32xbf16>
    %c6 = arith.constant 6 : index
    %c0_95 = arith.constant 0 : index
    %c0_96 = arith.constant 0 : index
    %106 = vector.load %arg4[%c6, %c0_95, %c0_96] : memref<9x32x64xbf16, #tpu.memory_space<vmem>>, vector<1x32x64xbf16>
    %107 = vector.shape_cast %106 : vector<1x32x64xbf16> to vector<32x64xbf16>
    %cst_97 = arith.constant dense<0.000000e+00> : vector<3x64xf32>
    %108 = tpu.matmul %105, %107, %cst_97 {dimension_numbers = #tpu.dot_dimension_numbers<[1], [0], [0], [1], [0, 0, 1, 1], [], []>} : vector<3x32xbf16>, vector<32x64xbf16>, vector<3x64xf32> -> vector<3x64xf32>
    %109 = arith.addf %102, %108 : vector<3x64xf32>
    %c1_98 = arith.constant 1 : index
    %c4_99 = arith.constant 4 : index
    %c0_100 = arith.constant 0 : index
    %110 = vector.load %arg7[%c1_98, %c4_99, %c0_100] : memref<4x16x32xf32, #tpu.memory_space<vmem>>, vector<1x3x32xf32>
    %111 = vector.shape_cast %110 : vector<1x3x32xf32> to vector<3x32xf32>
    %112 = arith.truncf %111 : vector<3x32xf32> to vector<3x32xbf16>
    %c7 = arith.constant 7 : index
    %c0_101 = arith.constant 0 : index
    %c0_102 = arith.constant 0 : index
    %113 = vector.load %arg4[%c7, %c0_101, %c0_102] : memref<9x32x64xbf16, #tpu.memory_space<vmem>>, vector<1x32x64xbf16>
    %114 = vector.shape_cast %113 : vector<1x32x64xbf16> to vector<32x64xbf16>
    %cst_103 = arith.constant dense<0.000000e+00> : vector<3x64xf32>
    %115 = tpu.matmul %112, %114, %cst_103 {dimension_numbers = #tpu.dot_dimension_numbers<[1], [0], [0], [1], [0, 0, 1, 1], [], []>} : vector<3x32xbf16>, vector<32x64xbf16>, vector<3x64xf32> -> vector<3x64xf32>
    %116 = arith.addf %109, %115 : vector<3x64xf32>
    %c0_104 = arith.constant 0 : index
    %c5_105 = arith.constant 5 : index
    %c0_106 = arith.constant 0 : index
    %117 = vector.load %arg7[%c0_104, %c5_105, %c0_106] : memref<4x16x32xf32, #tpu.memory_space<vmem>>, vector<1x3x32xf32>
    %118 = vector.shape_cast %117 : vector<1x3x32xf32> to vector<3x32xf32>
    %119 = arith.truncf %118 : vector<3x32xf32> to vector<3x32xbf16>
    %c8 = arith.constant 8 : index
    %c0_107 = arith.constant 0 : index
    %c0_108 = arith.constant 0 : index
    %120 = vector.load %arg4[%c8, %c0_107, %c0_108] : memref<9x32x64xbf16, #tpu.memory_space<vmem>>, vector<1x32x64xbf16>
    %121 = vector.shape_cast %120 : vector<1x32x64xbf16> to vector<32x64xbf16>
    %cst_109 = arith.constant dense<0.000000e+00> : vector<3x64xf32>
    %122 = tpu.matmul %119, %121, %cst_109 {dimension_numbers = #tpu.dot_dimension_numbers<[1], [0], [0], [1], [0, 0, 1, 1], [], []>} : vector<3x32xbf16>, vector<32x64xbf16>, vector<3x64xf32> -> vector<3x64xf32>
    %123 = arith.addf %116, %122 : vector<3x64xf32>
    %c0_110 = arith.constant 0 : index
    %c0_111 = arith.constant 0 : index
    %124 = vector.load %arg5[%c0_110, %c0_111] : memref<1x64xf32, #tpu.memory_space<vmem>>, vector<1x64xf32>
    %125 = vector.broadcast %124 : vector<1x64xf32> to vector<3x64xf32>
    %126 = arith.addf %123, %125 : vector<3x64xf32>
    %cst_112 = arith.constant 0.000000e+00 : f32
    %127 = vector.broadcast %cst_112 : f32 to vector<3x64xf32>
    %128 = arith.cmpf oge, %126, %127 : vector<3x64xf32>
    %cst_113 = arith.constant 0.00999999977 : f32
    %129 = vector.broadcast %cst_113 : f32 to vector<3x64xf32>
    %130 = arith.mulf %129, %126 : vector<3x64xf32>
    %131 = arith.select %128, %126, %130 : vector<3x64xi1>, vector<3x64xf32>
    %c0_114 = arith.constant 0 : index
    %c0_115 = arith.constant 0 : index
    %c0_116 = arith.constant 0 : index
    %c0_117 = arith.constant 0 : index
    %132 = vector.load %arg6[%c0_114, %c0_115, %c0_116, %c0_117] : memref<1x3x3x64xf32, #tpu.memory_space<vmem>>, vector<1x1x3x64xf32>
    %133 = vector.shape_cast %132 : vector<1x1x3x64xf32> to vector<3x64xf32>
    %134 = vector.shape_cast %131 : vector<3x64xf32> to vector<1x1x3x64xf32>
    tpu.vector_store %arg6[%c0_114, %c0_115, %c0_116, %c0_117], %134 {strides = array<i32>} : memref<1x3x3x64xf32, #tpu.memory_space<vmem>>, vector<1x1x3x64xf32>,
    %cst_118 = arith.constant 0.000000e+00 : f32
    %135 = vector.broadcast %cst_118 : f32 to vector<3x64xf32>
    %c0_119 = arith.constant 0 : index
    %c4_120 = arith.constant 4 : index
    %c0_121 = arith.constant 0 : index
    %136 = vector.load %arg7[%c0_119, %c4_120, %c0_121] : memref<4x16x32xf32, #tpu.memory_space<vmem>>, vector<1x3x32xf32>
    %137 = vector.shape_cast %136 : vector<1x3x32xf32> to vector<3x32xf32>
    %138 = arith.truncf %137 : vector<3x32xf32> to vector<3x32xbf16>
    %c0_122 = arith.constant 0 : index
    %c0_123 = arith.constant 0 : index
    %c0_124 = arith.constant 0 : index
    %139 = vector.load %arg4[%c0_122, %c0_123, %c0_124] : memref<9x32x64xbf16, #tpu.memory_space<vmem>>, vector<1x32x64xbf16>
    %140 = vector.shape_cast %139 : vector<1x32x64xbf16> to vector<32x64xbf16>
    %cst_125 = arith.constant dense<0.000000e+00> : vector<3x64xf32>
    %141 = tpu.matmul %138, %140, %cst_125 {dimension_numbers = #tpu.dot_dimension_numbers<[1], [0], [0], [1], [0, 0, 1, 1], [], []>} : vector<3x32xbf16>, vector<32x64xbf16>, vector<3x64xf32> -> vector<3x64xf32>
    %142 = arith.addf %135, %141 : vector<3x64xf32>
    %c1_126 = arith.constant 1 : index
    %c4_127 = arith.constant 4 : index
    %c0_128 = arith.constant 0 : index
    %143 = vector.load %arg7[%c1_126, %c4_127, %c0_128] : memref<4x16x32xf32, #tpu.memory_space<vmem>>, vector<1x3x32xf32>
    %144 = vector.shape_cast %143 : vector<1x3x32xf32> to vector<3x32xf32>
    %145 = arith.truncf %144 : vector<3x32xf32> to vector<3x32xbf16>
    %c1_129 = arith.constant 1 : index
    %c0_130 = arith.constant 0 : index
    %c0_131 = arith.constant 0 : index
    %146 = vector.load %arg4[%c1_129, %c0_130, %c0_131] : memref<9x32x64xbf16, #tpu.memory_space<vmem>>, vector<1x32x64xbf16>
    %147 = vector.shape_cast %146 : vector<1x32x64xbf16> to vector<32x64xbf16>
    %cst_132 = arith.constant dense<0.000000e+00> : vector<3x64xf32>
    %148 = tpu.matmul %145, %147, %cst_132 {dimension_numbers = #tpu.dot_dimension_numbers<[1], [0], [0], [1], [0, 0, 1, 1], [], []>} : vector<3x32xbf16>, vector<32x64xbf16>, vector<3x64xf32> -> vector<3x64xf32>
    %149 = arith.addf %142, %148 : vector<3x64xf32>
    %c0_133 = arith.constant 0 : index
    %c5_134 = arith.constant 5 : index
    %c0_135 = arith.constant 0 : index
    %150 = vector.load %arg7[%c0_133, %c5_134, %c0_135] : memref<4x16x32xf32, #tpu.memory_space<vmem>>, vector<1x3x32xf32>
    %151 = vector.shape_cast %150 : vector<1x3x32xf32> to vector<3x32xf32>
    %152 = arith.truncf %151 : vector<3x32xf32> to vector<3x32xbf16>
    %c2_136 = arith.constant 2 : index
    %c0_137 = arith.constant 0 : index
    %c0_138 = arith.constant 0 : index
    %153 = vector.load %arg4[%c2_136, %c0_137, %c0_138] : memref<9x32x64xbf16, #tpu.memory_space<vmem>>, vector<1x32x64xbf16>
    %154 = vector.shape_cast %153 : vector<1x32x64xbf16> to vector<32x64xbf16>
    %cst_139 = arith.constant dense<0.000000e+00> : vector<3x64xf32>
    %155 = tpu.matmul %152, %154, %cst_139 {dimension_numbers = #tpu.dot_dimension_numbers<[1], [0], [0], [1], [0, 0, 1, 1], [], []>} : vector<3x32xbf16>, vector<32x64xbf16>, vector<3x64xf32> -> vector<3x64xf32>
    %156 = arith.addf %149, %155 : vector<3x64xf32>
    %c2_140 = arith.constant 2 : index
    %c4_141 = arith.constant 4 : index
    %c0_142 = arith.constant 0 : index
    %157 = vector.load %arg7[%c2_140, %c4_141, %c0_142] : memref<4x16x32xf32, #tpu.memory_space<vmem>>, vector<1x3x32xf32>
    %158 = vector.shape_cast %157 : vector<1x3x32xf32> to vector<3x32xf32>
    %159 = arith.truncf %158 : vector<3x32xf32> to vector<3x32xbf16>
    %c3_143 = arith.constant 3 : index
    %c0_144 = arith.constant 0 : index
    %c0_145 = arith.constant 0 : index
    %160 = vector.load %arg4[%c3_143, %c0_144, %c0_145] : memref<9x32x64xbf16, #tpu.memory_space<vmem>>, vector<1x32x64xbf16>
    %161 = vector.shape_cast %160 : vector<1x32x64xbf16> to vector<32x64xbf16>
    %cst_146 = arith.constant dense<0.000000e+00> : vector<3x64xf32>
    %162 = tpu.matmul %159, %161, %cst_146 {dimension_numbers = #tpu.dot_dimension_numbers<[1], [0], [0], [1], [0, 0, 1, 1], [], []>} : vector<3x32xbf16>, vector<32x64xbf16>, vector<3x64xf32> -> vector<3x64xf32>
    %163 = arith.addf %156, %162 : vector<3x64xf32>
    %c3_147 = arith.constant 3 : index
    %c4_148 = arith.constant 4 : index
    %c0_149 = arith.constant 0 : index
    %164 = vector.load %arg7[%c3_147, %c4_148, %c0_149] : memref<4x16x32xf32, #tpu.memory_space<vmem>>, vector<1x3x32xf32>
    %165 = vector.shape_cast %164 : vector<1x3x32xf32> to vector<3x32xf32>
    %166 = arith.truncf %165 : vector<3x32xf32> to vector<3x32xbf16>
    %c4_150 = arith.constant 4 : index
    %c0_151 = arith.constant 0 : index
    %c0_152 = arith.constant 0 : index
    %167 = vector.load %arg4[%c4_150, %c0_151, %c0_152] : memref<9x32x64xbf16, #tpu.memory_space<vmem>>, vector<1x32x64xbf16>
    %168 = vector.shape_cast %167 : vector<1x32x64xbf16> to vector<32x64xbf16>
    %cst_153 = arith.constant dense<0.000000e+00> : vector<3x64xf32>
    %169 = tpu.matmul %166, %168, %cst_153 {dimension_numbers = #tpu.dot_dimension_numbers<[1], [0], [0], [1], [0, 0, 1, 1], [], []>} : vector<3x32xbf16>, vector<32x64xbf16>, vector<3x64xf32> -> vector<3x64xf32>
    %170 = arith.addf %163, %169 : vector<3x64xf32>
    %c2_154 = arith.constant 2 : index
    %c5_155 = arith.constant 5 : index
    %c0_156 = arith.constant 0 : index
    %171 = vector.load %arg7[%c2_154, %c5_155, %c0_156] : memref<4x16x32xf32, #tpu.memory_space<vmem>>, vector<1x3x32xf32>
    %172 = vector.shape_cast %171 : vector<1x3x32xf32> to vector<3x32xf32>
    %173 = arith.truncf %172 : vector<3x32xf32> to vector<3x32xbf16>
    %c5_157 = arith.constant 5 : index
    %c0_158 = arith.constant 0 : index
    %c0_159 = arith.constant 0 : index
    %174 = vector.load %arg4[%c5_157, %c0_158, %c0_159] : memref<9x32x64xbf16, #tpu.memory_space<vmem>>, vector<1x32x64xbf16>
    %175 = vector.shape_cast %174 : vector<1x32x64xbf16> to vector<32x64xbf16>
    %cst_160 = arith.constant dense<0.000000e+00> : vector<3x64xf32>
    %176 = tpu.matmul %173, %175, %cst_160 {dimension_numbers = #tpu.dot_dimension_numbers<[1], [0], [0], [1], [0, 0, 1, 1], [], []>} : vector<3x32xbf16>, vector<32x64xbf16>, vector<3x64xf32> -> vector<3x64xf32>
    %177 = arith.addf %170, %176 : vector<3x64xf32>
    %c0_161 = arith.constant 0 : index
    %c8_162 = arith.constant 8 : index
    %c0_163 = arith.constant 0 : index
    %178 = vector.load %arg7[%c0_161, %c8_162, %c0_163] : memref<4x16x32xf32, #tpu.memory_space<vmem>>, vector<1x3x32xf32>
    %179 = vector.shape_cast %178 : vector<1x3x32xf32> to vector<3x32xf32>
    %180 = arith.truncf %179 : vector<3x32xf32> to vector<3x32xbf16>
    %c6_164 = arith.constant 6 : index
    %c0_165 = arith.constant 0 : index
    %c0_166 = arith.constant 0 : index
    %181 = vector.load %arg4[%c6_164, %c0_165, %c0_166] : memref<9x32x64xbf16, #tpu.memory_space<vmem>>, vector<1x32x64xbf16>
    %182 = vector.shape_cast %181 : vector<1x32x64xbf16> to vector<32x64xbf16>
    %cst_167 = arith.constant dense<0.000000e+00> : vector<3x64xf32>
    %183 = tpu.matmul %180, %182, %cst_167 {dimension_numbers = #tpu.dot_dimension_numbers<[1], [0], [0], [1], [0, 0, 1, 1], [], []>} : vector<3x32xbf16>, vector<32x64xbf16>, vector<3x64xf32> -> vector<3x64xf32>
    %184 = arith.addf %177, %183 : vector<3x64xf32>
    %c1_168 = arith.constant 1 : index
    %c8_169 = arith.constant 8 : index
    %c0_170 = arith.constant 0 : index
    %185 = vector.load %arg7[%c1_168, %c8_169, %c0_170] : memref<4x16x32xf32, #tpu.memory_space<vmem>>, vector<1x3x32xf32>
    %186 = vector.shape_cast %185 : vector<1x3x32xf32> to vector<3x32xf32>
    %187 = arith.truncf %186 : vector<3x32xf32> to vector<3x32xbf16>
    %c7_171 = arith.constant 7 : index
    %c0_172 = arith.constant 0 : index
    %c0_173 = arith.constant 0 : index
    %188 = vector.load %arg4[%c7_171, %c0_172, %c0_173] : memref<9x32x64xbf16, #tpu.memory_space<vmem>>, vector<1x32x64xbf16>
    %189 = vector.shape_cast %188 : vector<1x32x64xbf16> to vector<32x64xbf16>
    %cst_174 = arith.constant dense<0.000000e+00> : vector<3x64xf32>
    %190 = tpu.matmul %187, %189, %cst_174 {dimension_numbers = #tpu.dot_dimension_numbers<[1], [0], [0], [1], [0, 0, 1, 1], [], []>} : vector<3x32xbf16>, vector<32x64xbf16>, vector<3x64xf32> -> vector<3x64xf32>
    %191 = arith.addf %184, %190 : vector<3x64xf32>
    %c0_175 = arith.constant 0 : index
    %c9 = arith.constant 9 : index
    %c0_176 = arith.constant 0 : index
    %192 = vector.load %arg7[%c0_175, %c9, %c0_176] : memref<4x16x32xf32, #tpu.memory_space<vmem>>, vector<1x3x32xf32>
    %193 = vector.shape_cast %192 : vector<1x3x32xf32> to vector<3x32xf32>
    %194 = arith.truncf %193 : vector<3x32xf32> to vector<3x32xbf16>
    %c8_177 = arith.constant 8 : index
    %c0_178 = arith.constant 0 : index
    %c0_179 = arith.constant 0 : index
    %195 = vector.load %arg4[%c8_177, %c0_178, %c0_179] : memref<9x32x64xbf16, #tpu.memory_space<vmem>>, vector<1x32x64xbf16>
    %196 = vector.shape_cast %195 : vector<1x32x64xbf16> to vector<32x64xbf16>
    %cst_180 = arith.constant dense<0.000000e+00> : vector<3x64xf32>
    %197 = tpu.matmul %194, %196, %cst_180 {dimension_numbers = #tpu.dot_dimension_numbers<[1], [0], [0], [1], [0, 0, 1, 1], [], []>} : vector<3x32xbf16>, vector<32x64xbf16>, vector<3x64xf32> -> vector<3x64xf32>
    %198 = arith.addf %191, %197 : vector<3x64xf32>
    %c0_181 = arith.constant 0 : index
    %c0_182 = arith.constant 0 : index
    %199 = vector.load %arg5[%c0_181, %c0_182] : memref<1x64xf32, #tpu.memory_space<vmem>>, vector<1x64xf32>
    %200 = vector.broadcast %199 : vector<1x64xf32> to vector<3x64xf32>
    %201 = arith.addf %198, %200 : vector<3x64xf32>
    %cst_183 = arith.constant 0.000000e+00 : f32
    %202 = vector.broadcast %cst_183 : f32 to vector<3x64xf32>
    %203 = arith.cmpf oge, %201, %202 : vector<3x64xf32>
    %cst_184 = arith.constant 0.00999999977 : f32
    %204 = vector.broadcast %cst_184 : f32 to vector<3x64xf32>
    %205 = arith.mulf %204, %201 : vector<3x64xf32>
    %206 = arith.select %203, %201, %205 : vector<3x64xi1>, vector<3x64xf32>
    %c0_185 = arith.constant 0 : index
    %c1_186 = arith.constant 1 : index
    %c0_187 = arith.constant 0 : index
    %c0_188 = arith.constant 0 : index
    %207 = vector.load %arg6[%c0_185, %c1_186, %c0_187, %c0_188] : memref<1x3x3x64xf32, #tpu.memory_space<vmem>>, vector<1x1x3x64xf32>
    %208 = vector.shape_cast %207 : vector<1x1x3x64xf32> to vector<3x64xf32>
    %209 = vector.shape_cast %206 : vector<3x64xf32> to vector<1x1x3x64xf32>
    tpu.vector_store %arg6[%c0_185, %c1_186, %c0_187, %c0_188], %209 {strides = array<i32>} : memref<1x3x3x64xf32, #tpu.memory_space<vmem>>, vector<1x1x3x64xf32>,
    %cst_189 = arith.constant 0.000000e+00 : f32
    %210 = vector.broadcast %cst_189 : f32 to vector<3x64xf32>
    %c0_190 = arith.constant 0 : index
    %c8_191 = arith.constant 8 : index
    %c0_192 = arith.constant 0 : index
    %211 = vector.load %arg7[%c0_190, %c8_191, %c0_192] : memref<4x16x32xf32, #tpu.memory_space<vmem>>, vector<1x3x32xf32>
    %212 = vector.shape_cast %211 : vector<1x3x32xf32> to vector<3x32xf32>
    %213 = arith.truncf %212 : vector<3x32xf32> to vector<3x32xbf16>
    %c0_193 = arith.constant 0 : index
    %c0_194 = arith.constant 0 : index
    %c0_195 = arith.constant 0 : index
    %214 = vector.load %arg4[%c0_193, %c0_194, %c0_195] : memref<9x32x64xbf16, #tpu.memory_space<vmem>>, vector<1x32x64xbf16>
    %215 = vector.shape_cast %214 : vector<1x32x64xbf16> to vector<32x64xbf16>
    %cst_196 = arith.constant dense<0.000000e+00> : vector<3x64xf32>
    %216 = tpu.matmul %213, %215, %cst_196 {dimension_numbers = #tpu.dot_dimension_numbers<[1], [0], [0], [1], [0, 0, 1, 1], [], []>} : vector<3x32xbf16>, vector<32x64xbf16>, vector<3x64xf32> -> vector<3x64xf32>
    %217 = arith.addf %210, %216 : vector<3x64xf32>
    %c1_197 = arith.constant 1 : index
    %c8_198 = arith.constant 8 : index
    %c0_199 = arith.constant 0 : index
    %218 = vector.load %arg7[%c1_197, %c8_198, %c0_199] : memref<4x16x32xf32, #tpu.memory_space<vmem>>, vector<1x3x32xf32>
    %219 = vector.shape_cast %218 : vector<1x3x32xf32> to vector<3x32xf32>
    %220 = arith.truncf %219 : vector<3x32xf32> to vector<3x32xbf16>
    %c1_200 = arith.constant 1 : index
    %c0_201 = arith.constant 0 : index
    %c0_202 = arith.constant 0 : index
    %221 = vector.load %arg4[%c1_200, %c0_201, %c0_202] : memref<9x32x64xbf16, #tpu.memory_space<vmem>>, vector<1x32x64xbf16>
    %222 = vector.shape_cast %221 : vector<1x32x64xbf16> to vector<32x64xbf16>
    %cst_203 = arith.constant dense<0.000000e+00> : vector<3x64xf32>
    %223 = tpu.matmul %220, %222, %cst_203 {dimension_numbers = #tpu.dot_dimension_numbers<[1], [0], [0], [1], [0, 0, 1, 1], [], []>} : vector<3x32xbf16>, vector<32x64xbf16>, vector<3x64xf32> -> vector<3x64xf32>
    %224 = arith.addf %217, %223 : vector<3x64xf32>
    %c0_204 = arith.constant 0 : index
    %c9_205 = arith.constant 9 : index
    %c0_206 = arith.constant 0 : index
    %225 = vector.load %arg7[%c0_204, %c9_205, %c0_206] : memref<4x16x32xf32, #tpu.memory_space<vmem>>, vector<1x3x32xf32>
    %226 = vector.shape_cast %225 : vector<1x3x32xf32> to vector<3x32xf32>
    %227 = arith.truncf %226 : vector<3x32xf32> to vector<3x32xbf16>
    %c2_207 = arith.constant 2 : index
    %c0_208 = arith.constant 0 : index
    %c0_209 = arith.constant 0 : index
    %228 = vector.load %arg4[%c2_207, %c0_208, %c0_209] : memref<9x32x64xbf16, #tpu.memory_space<vmem>>, vector<1x32x64xbf16>
    %229 = vector.shape_cast %228 : vector<1x32x64xbf16> to vector<32x64xbf16>
    %cst_210 = arith.constant dense<0.000000e+00> : vector<3x64xf32>
    %230 = tpu.matmul %227, %229, %cst_210 {dimension_numbers = #tpu.dot_dimension_numbers<[1], [0], [0], [1], [0, 0, 1, 1], [], []>} : vector<3x32xbf16>, vector<32x64xbf16>, vector<3x64xf32> -> vector<3x64xf32>
    %231 = arith.addf %224, %230 : vector<3x64xf32>
    %c2_211 = arith.constant 2 : index
    %c8_212 = arith.constant 8 : index
    %c0_213 = arith.constant 0 : index
    %232 = vector.load %arg7[%c2_211, %c8_212, %c0_213] : memref<4x16x32xf32, #tpu.memory_space<vmem>>, vector<1x3x32xf32>
    %233 = vector.shape_cast %232 : vector<1x3x32xf32> to vector<3x32xf32>
    %234 = arith.truncf %233 : vector<3x32xf32> to vector<3x32xbf16>
    %c3_214 = arith.constant 3 : index
    %c0_215 = arith.constant 0 : index
    %c0_216 = arith.constant 0 : index
    %235 = vector.load %arg4[%c3_214, %c0_215, %c0_216] : memref<9x32x64xbf16, #tpu.memory_space<vmem>>, vector<1x32x64xbf16>
    %236 = vector.shape_cast %235 : vector<1x32x64xbf16> to vector<32x64xbf16>
    %cst_217 = arith.constant dense<0.000000e+00> : vector<3x64xf32>
    %237 = tpu.matmul %234, %236, %cst_217 {dimension_numbers = #tpu.dot_dimension_numbers<[1], [0], [0], [1], [0, 0, 1, 1], [], []>} : vector<3x32xbf16>, vector<32x64xbf16>, vector<3x64xf32> -> vector<3x64xf32>
    %238 = arith.addf %231, %237 : vector<3x64xf32>
    %c3_218 = arith.constant 3 : index
    %c8_219 = arith.constant 8 : index
    %c0_220 = arith.constant 0 : index
    %239 = vector.load %arg7[%c3_218, %c8_219, %c0_220] : memref<4x16x32xf32, #tpu.memory_space<vmem>>, vector<1x3x32xf32>
    %240 = vector.shape_cast %239 : vector<1x3x32xf32> to vector<3x32xf32>
    %241 = arith.truncf %240 : vector<3x32xf32> to vector<3x32xbf16>
    %c4_221 = arith.constant 4 : index
    %c0_222 = arith.constant 0 : index
    %c0_223 = arith.constant 0 : index
    %242 = vector.load %arg4[%c4_221, %c0_222, %c0_223] : memref<9x32x64xbf16, #tpu.memory_space<vmem>>, vector<1x32x64xbf16>
    %243 = vector.shape_cast %242 : vector<1x32x64xbf16> to vector<32x64xbf16>
    %cst_224 = arith.constant dense<0.000000e+00> : vector<3x64xf32>
    %244 = tpu.matmul %241, %243, %cst_224 {dimension_numbers = #tpu.dot_dimension_numbers<[1], [0], [0], [1], [0, 0, 1, 1], [], []>} : vector<3x32xbf16>, vector<32x64xbf16>, vector<3x64xf32> -> vector<3x64xf32>
    %245 = arith.addf %238, %244 : vector<3x64xf32>
    %c2_225 = arith.constant 2 : index
    %c9_226 = arith.constant 9 : index
    %c0_227 = arith.constant 0 : index
    %246 = vector.load %arg7[%c2_225, %c9_226, %c0_227] : memref<4x16x32xf32, #tpu.memory_space<vmem>>, vector<1x3x32xf32>
    %247 = vector.shape_cast %246 : vector<1x3x32xf32> to vector<3x32xf32>
    %248 = arith.truncf %247 : vector<3x32xf32> to vector<3x32xbf16>
    %c5_228 = arith.constant 5 : index
    %c0_229 = arith.constant 0 : index
    %c0_230 = arith.constant 0 : index
    %249 = vector.load %arg4[%c5_228, %c0_229, %c0_230] : memref<9x32x64xbf16, #tpu.memory_space<vmem>>, vector<1x32x64xbf16>
    %250 = vector.shape_cast %249 : vector<1x32x64xbf16> to vector<32x64xbf16>
    %cst_231 = arith.constant dense<0.000000e+00> : vector<3x64xf32>
    %251 = tpu.matmul %248, %250, %cst_231 {dimension_numbers = #tpu.dot_dimension_numbers<[1], [0], [0], [1], [0, 0, 1, 1], [], []>} : vector<3x32xbf16>, vector<32x64xbf16>, vector<3x64xf32> -> vector<3x64xf32>
    %252 = arith.addf %245, %251 : vector<3x64xf32>
    %c0_232 = arith.constant 0 : index
    %c12 = arith.constant 12 : index
    %c0_233 = arith.constant 0 : index
    %253 = vector.load %arg7[%c0_232, %c12, %c0_233] : memref<4x16x32xf32, #tpu.memory_space<vmem>>, vector<1x3x32xf32>
    %254 = vector.shape_cast %253 : vector<1x3x32xf32> to vector<3x32xf32>
    %255 = arith.truncf %254 : vector<3x32xf32> to vector<3x32xbf16>
    %c6_234 = arith.constant 6 : index
    %c0_235 = arith.constant 0 : index
    %c0_236 = arith.constant 0 : index
    %256 = vector.load %arg4[%c6_234, %c0_235, %c0_236] : memref<9x32x64xbf16, #tpu.memory_space<vmem>>, vector<1x32x64xbf16>
    %257 = vector.shape_cast %256 : vector<1x32x64xbf16> to vector<32x64xbf16>
    %cst_237 = arith.constant dense<0.000000e+00> : vector<3x64xf32>
    %258 = tpu.matmul %255, %257, %cst_237 {dimension_numbers = #tpu.dot_dimension_numbers<[1], [0], [0], [1], [0, 0, 1, 1], [], []>} : vector<3x32xbf16>, vector<32x64xbf16>, vector<3x64xf32> -> vector<3x64xf32>
    %259 = arith.addf %252, %258 : vector<3x64xf32>
    %c1_238 = arith.constant 1 : index
    %c12_239 = arith.constant 12 : index
    %c0_240 = arith.constant 0 : index
    %260 = vector.load %arg7[%c1_238, %c12_239, %c0_240] : memref<4x16x32xf32, #tpu.memory_space<vmem>>, vector<1x3x32xf32>
    %261 = vector.shape_cast %260 : vector<1x3x32xf32> to vector<3x32xf32>
    %262 = arith.truncf %261 : vector<3x32xf32> to vector<3x32xbf16>
    %c7_241 = arith.constant 7 : index
    %c0_242 = arith.constant 0 : index
    %c0_243 = arith.constant 0 : index
    %263 = vector.load %arg4[%c7_241, %c0_242, %c0_243] : memref<9x32x64xbf16, #tpu.memory_space<vmem>>, vector<1x32x64xbf16>
    %264 = vector.shape_cast %263 : vector<1x32x64xbf16> to vector<32x64xbf16>
    %cst_244 = arith.constant dense<0.000000e+00> : vector<3x64xf32>
    %265 = tpu.matmul %262, %264, %cst_244 {dimension_numbers = #tpu.dot_dimension_numbers<[1], [0], [0], [1], [0, 0, 1, 1], [], []>} : vector<3x32xbf16>, vector<32x64xbf16>, vector<3x64xf32> -> vector<3x64xf32>
    %266 = arith.addf %259, %265 : vector<3x64xf32>
    %c0_245 = arith.constant 0 : index
    %c13 = arith.constant 13 : index
    %c0_246 = arith.constant 0 : index
    %267 = vector.load %arg7[%c0_245, %c13, %c0_246] : memref<4x16x32xf32, #tpu.memory_space<vmem>>, vector<1x3x32xf32>
    %268 = vector.shape_cast %267 : vector<1x3x32xf32> to vector<3x32xf32>
    %269 = arith.truncf %268 : vector<3x32xf32> to vector<3x32xbf16>
    %c8_247 = arith.constant 8 : index
    %c0_248 = arith.constant 0 : index
    %c0_249 = arith.constant 0 : index
    %270 = vector.load %arg4[%c8_247, %c0_248, %c0_249] : memref<9x32x64xbf16, #tpu.memory_space<vmem>>, vector<1x32x64xbf16>
    %271 = vector.shape_cast %270 : vector<1x32x64xbf16> to vector<32x64xbf16>
    %cst_250 = arith.constant dense<0.000000e+00> : vector<3x64xf32>
    %272 = tpu.matmul %269, %271, %cst_250 {dimension_numbers = #tpu.dot_dimension_numbers<[1], [0], [0], [1], [0, 0, 1, 1], [], []>} : vector<3x32xbf16>, vector<32x64xbf16>, vector<3x64xf32> -> vector<3x64xf32>
    %273 = arith.addf %266, %272 : vector<3x64xf32>
    %c0_251 = arith.constant 0 : index
    %c0_252 = arith.constant 0 : index
    %274 = vector.load %arg5[%c0_251, %c0_252] : memref<1x64xf32, #tpu.memory_space<vmem>>, vector<1x64xf32>
    %275 = vector.broadcast %274 : vector<1x64xf32> to vector<3x64xf32>
    %276 = arith.addf %273, %275 : vector<3x64xf32>
    %cst_253 = arith.constant 0.000000e+00 : f32
    %277 = vector.broadcast %cst_253 : f32 to vector<3x64xf32>
    %278 = arith.cmpf oge, %276, %277 : vector<3x64xf32>
    %cst_254 = arith.constant 0.00999999977 : f32
    %279 = vector.broadcast %cst_254 : f32 to vector<3x64xf32>
    %280 = arith.mulf %279, %276 : vector<3x64xf32>
    %281 = arith.select %278, %276, %280 : vector<3x64xi1>, vector<3x64xf32>
    %c0_255 = arith.constant 0 : index
    %c2_256 = arith.constant 2 : index
    %c0_257 = arith.constant 0 : index
    %c0_258 = arith.constant 0 : index
    %282 = vector.load %arg6[%c0_255, %c2_256, %c0_257, %c0_258] : memref<1x3x3x64xf32, #tpu.memory_space<vmem>>, vector<1x1x3x64xf32>
    %283 = vector.shape_cast %282 : vector<1x1x3x64xf32> to vector<3x64xf32>
    %284 = vector.shape_cast %281 : vector<3x64xf32> to vector<1x1x3x64xf32>
    tpu.vector_store %arg6[%c0_255, %c2_256, %c0_257, %c0_258], %284 {strides = array<i32>} : memref<1x3x3x64xf32, #tpu.memory_space<vmem>>, vector<1x1x3x64xf32>,
    return
  }
  func.func @transform_0(%arg0: i32) -> (i32, i32, i32, i32) {
    %c0_i32 = arith.constant 0 : i32
    %c0_i32_0 = arith.constant 0 : i32
    %c0_i32_1 = arith.constant 0 : i32
    %c0_i32_2 = arith.constant 0 : i32
    return %arg0, %c0_i32, %c0_i32_0, %c0_i32_1 : i32, i32, i32, i32
  }
  func.func @transform_1(%arg0: i32) -> (i32, i32) {
    %c0_i32 = arith.constant 0 : i32
    %c0_i32_0 = arith.constant 0 : i32
    %c0_i32_1 = arith.constant 0 : i32
    return %c0_i32, %c0_i32_0 : i32, i32
  }
  func.func @transform_2(%arg0: i32) -> (i32, i32) {
    %c0_i32 = arith.constant 0 : i32
    %c0_i32_0 = arith.constant 0 : i32
    %c0_i32_1 = arith.constant 0 : i32
    return %c0_i32, %c0_i32_0 : i32, i32
  }
  func.func @transform_3(%arg0: i32) -> (i32, i32, i32) {
    %c0_i32 = arith.constant 0 : i32
    %c0_i32_0 = arith.constant 0 : i32
    %c0_i32_1 = arith.constant 0 : i32
    %c0_i32_2 = arith.constant 0 : i32
    return %c0_i32, %c0_i32_0, %c0_i32_1 : i32, i32, i32
  }
  func.func @transform_4(%arg0: i32) -> (i32, i32) {
    %c0_i32 = arith.constant 0 : i32
    %c0_i32_0 = arith.constant 0 : i32
    %c0_i32_1 = arith.constant 0 : i32
    return %c0_i32, %c0_i32_0 : i32, i32
  }
  func.func @transform_5(%arg0: i32) -> (i32, i32, i32, i32) {
    %c0_i32 = arith.constant 0 : i32
    %c0_i32_0 = arith.constant 0 : i32
    %c0_i32_1 = arith.constant 0 : i32
    %c0_i32_2 = arith.constant 0 : i32
    return %arg0, %c0_i32, %c0_i32_0, %c0_i32_1 : i32, i32, i32, i32
  }
}

module attributes {stable_mosaic.version = 11 : i64} {
  func.func @_fc_softmax_kernel(%arg0: i32, %arg1: memref<2x640xbf16, #tpu.memory_space<vmem>>, %arg2: memref<640x4xbf16, #tpu.memory_space<vmem>>, %arg3: memref<1x4xf32, #tpu.memory_space<vmem>>, %arg4: memref<2x4xf32, #tpu.memory_space<vmem>>, %arg5: memref<2x4xf32, #tpu.memory_space<vmem>>) attributes {dimension_semantics = [#tpu.dimension_semantics<arbitrary>], iteration_bounds = array<i64: 1>, scalar_prefetch = 0 : i64, scratch_operands = 1 : i64, tpu.core_type = #tpu.core_type<tc>, window_params = [{transform_indices = @transform_0, window_bounds = array<i64: 2, 640>}, {transform_indices = @transform_1, window_bounds = array<i64: 640, 4>}, {pipeline_mode = #tpu.pipeline_mode<synchronous>, transform_indices = @transform_2, window_bounds = array<i64: 1, 4>}, {pipeline_mode = #tpu.pipeline_mode<synchronous>, transform_indices = @transform_3, window_bounds = array<i64: 2, 4>}]} {
    %c0_i32 = arith.constant 0 : i32
    %0 = arith.cmpi eq, %arg0, %c0_i32 : i32
    %1 = arith.extui %0 : i1 to i32
    %c0_i32_0 = arith.constant 0 : i32
    %2 = arith.cmpi ne, %1, %c0_i32_0 : i32
    scf.if %2 {
      %cst_10 = arith.constant 0.000000e+00 : f32
      %12 = vector.broadcast %cst_10 : f32 to vector<2x4xf32>
      %c0_11 = arith.constant 0 : index
      %c0_12 = arith.constant 0 : index
      %13 = vector.load %arg5[%c0_11, %c0_12] : memref<2x4xf32, #tpu.memory_space<vmem>>, vector<2x4xf32>
      tpu.vector_store %arg5[%c0_11, %c0_12], %12 {strides = array<i32>} : memref<2x4xf32, #tpu.memory_space<vmem>>, vector<2x4xf32>,
    } else {
    }
    %c0 = arith.constant 0 : index
    %c0_1 = arith.constant 0 : index
    %3 = vector.load %arg5[%c0, %c0_1] : memref<2x4xf32, #tpu.memory_space<vmem>>, vector<2x4xf32>
    %c0_2 = arith.constant 0 : index
    %c0_3 = arith.constant 0 : index
    %4 = vector.load %arg1[%c0_2, %c0_3] : memref<2x640xbf16, #tpu.memory_space<vmem>>, vector<2x640xbf16>
    %c0_4 = arith.constant 0 : index
    %c0_5 = arith.constant 0 : index
    %5 = vector.load %arg2[%c0_4, %c0_5] : memref<640x4xbf16, #tpu.memory_space<vmem>>, vector<640x4xbf16>
    %cst = arith.constant dense<0.000000e+00> : vector<2x4xf32>
    %6 = tpu.matmul %4, %5, %cst {dimension_numbers = #tpu.dot_dimension_numbers<[1], [0], [0], [1], [0, 0, 1, 1], [], []>} : vector<2x640xbf16>, vector<640x4xbf16>, vector<2x4xf32> -> vector<2x4xf32>
    %7 = arith.addf %3, %6 : vector<2x4xf32>
    %c0_6 = arith.constant 0 : index
    %c0_7 = arith.constant 0 : index
    %8 = vector.load %arg5[%c0_6, %c0_7] : memref<2x4xf32, #tpu.memory_space<vmem>>, vector<2x4xf32>
    tpu.vector_store %arg5[%c0_6, %c0_7], %7 {strides = array<i32>} : memref<2x4xf32, #tpu.memory_space<vmem>>, vector<2x4xf32>,
    %c0_i32_8 = arith.constant 0 : i32
    %9 = arith.cmpi eq, %arg0, %c0_i32_8 : i32
    %10 = arith.extui %9 : i1 to i32
    %c0_i32_9 = arith.constant 0 : i32
    %11 = arith.cmpi ne, %10, %c0_i32_9 : i32
    scf.if %11 {
      %c0_10 = arith.constant 0 : index
      %c0_11 = arith.constant 0 : index
      %12 = vector.load %arg5[%c0_10, %c0_11] : memref<2x4xf32, #tpu.memory_space<vmem>>, vector<2x4xf32>
      %c0_12 = arith.constant 0 : index
      %c0_13 = arith.constant 0 : index
      %13 = vector.load %arg3[%c0_12, %c0_13] : memref<1x4xf32, #tpu.memory_space<vmem>>, vector<1x4xf32>
      %14 = vector.broadcast %13 : vector<1x4xf32> to vector<2x4xf32>
      %15 = arith.addf %12, %14 : vector<2x4xf32>
      %cst_14 = arith.constant dense<0xFF800000> : vector<2xf32>
      %16 = vector.multi_reduction <maximumf>, %15, %cst_14 [1] : vector<2x4xf32> to vector<2xf32>
      %17 = vector.shape_cast %16 : vector<2xf32> to vector<2x1xf32>
      %18 = vector.broadcast %17 : vector<2x1xf32> to vector<2x4xf32>
      %19 = arith.subf %15, %18 : vector<2x4xf32>
      %20 = math.exp %19 : vector<2x4xf32>
      %cst_15 = arith.constant dense<0.000000e+00> : vector<2xf32>
      %21 = vector.multi_reduction <add>, %20, %cst_15 [1] : vector<2x4xf32> to vector<2xf32>
      %22 = vector.shape_cast %21 : vector<2xf32> to vector<2x1xf32>
      %23 = tpu.reciprocal %22 {approx = true} : vector<2x1xf32> -> vector<2x1xf32>
      %24 = vector.broadcast %23 : vector<2x1xf32> to vector<2x4xf32>
      %25 = arith.mulf %20, %24 : vector<2x4xf32>
      %c0_16 = arith.constant 0 : index
      %c0_17 = arith.constant 0 : index
      %26 = vector.load %arg4[%c0_16, %c0_17] : memref<2x4xf32, #tpu.memory_space<vmem>>, vector<2x4xf32>
      tpu.vector_store %arg4[%c0_16, %c0_17], %25 {strides = array<i32>} : memref<2x4xf32, #tpu.memory_space<vmem>>, vector<2x4xf32>,
    } else {
    }
    return
  }
  func.func @transform_0(%arg0: i32) -> (i32, i32) {
    %c0_i32 = arith.constant 0 : i32
    %c0_i32_0 = arith.constant 0 : i32
    return %c0_i32, %arg0 : i32, i32
  }
  func.func @transform_1(%arg0: i32) -> (i32, i32) {
    %c0_i32 = arith.constant 0 : i32
    %c0_i32_0 = arith.constant 0 : i32
    return %arg0, %c0_i32 : i32, i32
  }
  func.func @transform_2(%arg0: i32) -> (i32, i32) {
    %c0_i32 = arith.constant 0 : i32
    %c0_i32_0 = arith.constant 0 : i32
    %c0_i32_1 = arith.constant 0 : i32
    return %c0_i32, %c0_i32_0 : i32, i32
  }
  func.func @transform_3(%arg0: i32) -> (i32, i32) {
    %c0_i32 = arith.constant 0 : i32
    %c0_i32_0 = arith.constant 0 : i32
    %c0_i32_1 = arith.constant 0 : i32
    return %c0_i32, %c0_i32_0 : i32, i32
  }
}

</mosaic_0001>

<bundles_post_ra>
// kernel: actor_forward.3
= control target key start
LH: loop header
LB: loop body
LE: loop exit
PB: predicated region body
PF: predicated region fallthrough
CT: control target
= control target key end

     0   :  { %s849_s0 = inlined_call_operand.vmem [shape: bf16[2,640], index: 0, kind: input, shape index: {}]   ;;  %s850_s1 = inlined_call_operand.vmem [shape: bf16[640,4], index: 1, kind: input, shape index: {}]   ;;  %s851_s2 = inlined_call_operand.vmem [shape: f32[1,4], index: 2, kind: input, shape index: {}]   ;;  %s852_s3 = inlined_call_operand.hbm [shape: f32[2,4], index: 3, kind: output, shape index: {}]  }
   0x1   :  { %v627_v0 = vld [vmem:[%s850_s1 + $0x38] sm:$0xff]  ;;  %v626_v3 = vld [vmem:[%s850_s1 + $0x30] sm:$0xff]  ;;  %v625_v8 = vld [vmem:[%s850_s1 + $0x28] sm:$0xff] }
   0x2   :  { %v643_v1 = vld [vmem:[%s850_s1 + $0xb8] sm:$0xff]  ;;  %355 = vmatpush.bf16.msra.mxu0 %v627_v0  ;;  %v642_v5 = vld [vmem:[%s850_s1 + $0xb0] sm:$0xff]  ;;  %v641_v9 = vld [vmem:[%s850_s1 + $0xa8] sm:$0xff] }
   0x3   :  { %v651_v2 = vld [vmem:[%s850_s1 + $0xf8] sm:$0xff]  ;;  %381 = vmatpush.bf16.msra.mxu2 %v643_v1  ;;  %v650_v6 = vld [vmem:[%s850_s1 + $0xf0] sm:$0xff]  ;;  %v649_v10 = vld [vmem:[%s850_s1 + $0xe8] sm:$0xff] }
   0x4   :  { %v635_v4 = vld [vmem:[%s850_s1 + $0x78] sm:$0xff]  ;;  %394 = vmatpush.bf16.msra.mxu3 %v651_v2  ;;  %v634_v7 = vld [vmem:[%s850_s1 + $0x70] sm:$0xff]  ;;  %v633_v11 = vld [vmem:[%s850_s1 + $0x68] sm:$0xff] }
   0x5   :  { %368 = vmatpush.bf16.msra.mxu1 %v635_v4  ;;  %v624_v12 = vld [vmem:[%s850_s1 + $0x20] sm:$0xff] }
   0x6   :  { %356 = vmatpush.bf16.msra.mxu0 %v626_v3  ;;  %v22_v13 = vld [vmem:[%s849_s0] sm:$0x1f] }
   0x7   :  { %382 = vmatpush.bf16.msra.mxu2 %v642_v5  ;;  %v640_v14 = vld [vmem:[%s850_s1 + $0xa0] sm:$0xff]  ;;  %104 = vst [vmem:[#allocation1] ss:$9 sm:$0xff] %v22_v13 }
   0x8   :  { %395 = vmatpush.bf16.msra.mxu3 %v650_v6  ;;  %v648_v15 = vld [vmem:[%s850_s1 + $0xe0] sm:$0xff] }
   0x9   :  { %369 = vmatpush.bf16.msra.mxu1 %v634_v7  ;;  %v632_v16 = vld [vmem:[%s850_s1 + $0x60] sm:$0xff] }
   0xa   :  { %357 = vmatpush.bf16.msra.mxu0 %v625_v8 }
   0xb   :  { %383 = vmatpush.bf16.msra.mxu2 %v641_v9 }
   0xc   :  { %396 = vmatpush.bf16.msra.mxu3 %v649_v10 }
   0xd   :  { %370 = vmatpush.bf16.msra.mxu1 %v633_v11 }
   0xe   :  { %8 = vsyncpa [#allocation4], 0  ;;  %358 = vmatpush.bf16.msra.mxu0 %v624_v12  ;;  %v623_v17 = vld [vmem:[%s850_s1 + $0x18] sm:$0xff]  ;;  %v622_v21 = vld [vmem:[%s850_s1 + $0x10] sm:$0xff]  ;;  %vm19_vm0 = vcmask 25600   ;;  %v693_v46 = vmov 0.0  }
   0xf   :  { %384 = vmatpush.bf16.msra.mxu2 %v640_v14  ;;  %v639_v18 = vld [vmem:[%s850_s1 + $0x98] sm:$0xff]  ;;  %v638_v22 = vld [vmem:[%s850_s1 + $0x90] sm:$0xff]  ;;  %v621_v25 = vld [vmem:[%s850_s1 + $0x8] sm:$0xff]  ;;  %20 = vst.msk [vmem:[#allocation2] sm:$0x3] %vm19_vm0, %v693_v46  ;;  %s694_s12 = smov [#allocation3]  }
  0x10   :  { %397 = vmatpush.bf16.msra.mxu3 %v648_v15  ;;  %v647_v19 = vld [vmem:[%s850_s1 + $0xd8] sm:$0xff]  ;;  %v646_v23 = vld [vmem:[%s850_s1 + $0xd0] sm:$0xff]  ;;  %v637_v26 = vld [vmem:[%s850_s1 + $0x88] sm:$0xff]  ;;  %s449_s13 = sshll.u32 %s694_s12, 4  ;;  %s450_s13 = int_to_ptr.vmem [resolvable:$true] %s449_s13 }
  0x11   :  { %371 = vmatpush.bf16.msra.mxu1 %v632_v16  ;;  %v631_v20 = vld [vmem:[%s850_s1 + $0x58] sm:$0xff]  ;;  %v630_v24 = vld [vmem:[%s850_s1 + $0x50] sm:$0xff]  ;;  %v645_v27 = vld [vmem:[%s850_s1 + $0xc8] sm:$0xff] }
  0x12   :  { %359 = vmatpush.bf16.msra.mxu0 %v623_v17  ;;  %v629_v28 = vld [vmem:[%s850_s1 + $0x48] sm:$0xff]  ;;  %v620_v29 = vld [vmem:[%s850_s1] sm:$0xff]  ;;  %v659_v30 = vld [vmem:[%s850_s1 + $0x138] sm:$0xff] }
  0x13   :  { %385 = vmatpush.bf16.msra.mxu2 %v639_v18  ;;  %v636_v31 = vld [vmem:[%s850_s1 + $0x80] sm:$0xff]  ;;  %v658_v35 = vld [vmem:[%s850_s1 + $0x130] sm:$0xff]  ;;  %v657_v39 = vld [vmem:[%s850_s1 + $0x128] sm:$0xff] }
  0x14   :  { %398 = vmatpush.bf16.msra.mxu3 %v647_v19  ;;  %v644_v32 = vld [vmem:[%s850_s1 + $0xc0] sm:$0xff]  ;;  %v107_v36 = vld [vmem:[#allocation1 + $0x12] sm:$0xff]  ;;  %v106_v38 = vld [vmem:[#allocation1 + $0x9] sm:$0xff] }
  0x15   :  { %372 = vmatpush.bf16.msra.mxu1 %v631_v20  ;;  %v628_v33 = vld [vmem:[%s850_s1 + $0x40] sm:$0xff]  ;;  %v655_v41 = vld [vmem:[%s850_s1 + $0x118] sm:$0xff]  ;;  %v654_v42 = vld [vmem:[%s850_s1 + $0x110] sm:$0xff] }
  0x16   :  { %360 = vmatpush.bf16.msra.mxu0 %v622_v21  ;;  %v105_v34 = vld [vmem:[#allocation1] sm:$0xff]  ;;  %v653_v43 = vld [vmem:[%s850_s1 + $0x108] sm:$0xff] }
  0x17   :  { %386 = vmatpush.bf16.msra.mxu2 %v638_v22  ;;  %v108_v37 = vld [vmem:[#allocation1 + $0x1b] sm:$0xff]  ;;  %v109_v45 = vld [vmem:[#allocation1 + $0x24] sm:$0xff] }
  0x18   :  { %399 = vmatpush.bf16.msra.mxu3 %v646_v23  ;;  %v656_v40 = vld [vmem:[%s850_s1 + $0x120] sm:$0xff]  ;;  %v21_v58 = vld [vmem:[#allocation2] sm:$0x3] }
  0x19   :  { %373 = vmatpush.bf16.msra.mxu1 %v630_v24  ;;  %v652_v44 = vld [vmem:[%s850_s1 + $0x100] sm:$0xff] }
  0x1a   :  { %361 = vmatpush.bf16.msra.mxu0 %v621_v25  ;;  %v662_v63 = vld [vmem:[%s851_s2] ss:$0 sm:$0xff]  ;;  %s451_s2 = sshll.u32 %s852_s3, 4  ;;  %s452_s2 = int_to_ptr.hbm [resolvable:$true] %s451_s2 }
  0x1b   :  { %387 = vmatpush.bf16.msra.mxu2 %v637_v26 }
  0x1c   :  { %400 = vmatpush.bf16.msra.mxu3 %v645_v27 }
  0x1d   :  { %374 = vmatpush.bf16.msra.mxu1 %v629_v28 }
  0x1e   :  { %362 = vmatpush.bf16.msra.mxu0 %v620_v29 }
  0x1f   :  { %388 = vmatpush.bf16.msra.mxu2 %v636_v31 }
  0x20   :  { %401 = vmatpush.bf16.msra.mxu3 %v644_v32 }
  0x21   :  { %375 = vmatpush.bf16.msra.mxu1 %v628_v33  ;;  %363 = vmatmul.bf16.vlgmr.msra.gmra.mxu0 %v105_v34 }
  0x22   :  { %407 = vmatpush.bf16.msrb.mxu0 %v659_v30  ;;  %389 = vmatmul.bf16.vlgmr.msra.gmra.mxu2 %v107_v36 }
  0x23   :  { %402 = vmatmul.bf16.vlgmr.msra.gmra.mxu3 %v108_v37 }
  0x24   :  { %376 = vmatmul.bf16.vlgmr.msra.gmra.mxu1 %v106_v38 }
  0x26   :  { %408 = vmatpush.bf16.msrb.mxu0 %v658_v35 }
  0x2a   :  { %409 = vmatpush.bf16.msrb.mxu0 %v657_v39 }
  0x2e   :  { %410 = vmatpush.bf16.msrb.mxu0 %v656_v40 }
  0x32   :  { %411 = vmatpush.bf16.msrb.mxu0 %v655_v41 }
  0x36   :  { %412 = vmatpush.bf16.msrb.mxu0 %v654_v42 }
  0x3a   :  { %413 = vmatpush.bf16.msrb.mxu0 %v653_v43 }
  0x3e   :  { %414 = vmatpush.bf16.msrb.mxu0 %v652_v44 }
  0x41   :  { %415 = vmatmul.bf16.vlgmr.msrb.gmra.mxu0 %v109_v45 }
  0x9e   :  { %v364_v47 = vpop.f32.mrf.mxu0 }
  0xa1   :  { %v377_v48 = vpop.f32.mrf.mxu1 }
  0xa2   :  { %v378_v55 = vadd.f32 %v377_v48, %v364_v47 }
  0xa5   :  { %v390_v49 = vpop.f32.mrf.mxu2 }
  0xa6   :  { %v366_v50 = vpop.f32.mrf.mxu0  ;;  %v403_v51 = vpop.f32.mrf.mxu3  ;;  %v391_v56 = vadd.f32 %v390_v49, %v378_v55 }
  0xa8   :  { %v404_v57 = vadd.f32 %v403_v51, %v391_v56 }
  0xa9   :  { %v379_v52 = vpop.f32.mrf.mxu1 }
  0xad   :  { %v392_v53 = vpop.f32.mrf.mxu2 }
  0xae   :  { %v405_v54 = vpop.f32.mrf.mxu3 }
  0xbe   :  { %v416_v59 = vpop.f32.mrf.mxu0 }
  0xbf   :  { %v417_v60 = vadd.f32 %v416_v59, %v404_v57 }
  0xc1   :  { %v420_v61 = vadd.f32 %v417_v60, %v21_v58 }
  0xc3   :  { %422 = vst.msk [vmem:[#allocation2] sm:$0x3] %vm19_vm0, %v420_v61 }
  0xc6   :  { %v418_v62 = vpop.f32.mrf.mxu0 }
  0xca   :  { %v426_v0 = vld [vmem:[#allocation2] sm:$0x3] }
  0xcb   :  { %v431_v1 = vadd.f32 %v662_v63, %v426_v0 }
  0xcd   :  { %v432_v2 = vsel %vm19_vm0, %v431_v1, -inf }
  0xce   :  { %433 = vmax.xlane.f32.xlu0 %v432_v2 }
 0x141   :  { %v434_v3 = vpop.xlane.xlu0 %433 }
 0x142   :  { %v435_v4 = vsub.f32 %v431_v1, %v434_v3 }
 0x144   :  { %v436_v5 = vmul.f32 1.442695, %v435_v4 }
 0x146   :  { %663 = vpow2.f32 %v436_v5 }
 0x14c   :  { %v664_v6 = vpop.eup %663 }
 0x14d   :  { %v438_v7 = vsel %vm19_vm0, %v664_v6, 0.0 }
 0x14e   :  { %439 = vadd.xlane.f32.xlu0 %v438_v7 }
 0x1c1   :  { %v440_v8 = vpop.xlane.xlu0 %439 }
 0x1c2   :  { %665 = vrcp.f32 %v440_v8 }
 0x1c8   :  { %v666_v9 = vpop.eup %665 }
 0x1c9   :  { %v442_v10 = vmul.f32 %v666_v9, %v664_v6 }
 0x1cb   :  { %443 = vst.msk [vmem:[#allocation3] sm:$0x3] %vm19_vm0, %v442_v10 }
 0x1cc   :  { %454 = dma.vmem_to_hbm [thread:$0]  %s450_s13, 32, %s452_s2, [#allocation4]  }
 0x1cd   :  { %691 = dma.done.wait [#allocation4], 32  }
 0x1ce   :  { %692 = vsyncadd [#allocation4], 4294967264 }
 0x1cf   :  { %459 = vsyncpa [#allocation4], 1 }

// kernel: actor_forward.2
= control target key start
LH: loop header
LB: loop body
LE: loop exit
PB: predicated region body
PF: predicated region fallthrough
CT: control target
= control target key end

     0   :  { %s2003_s18 = smov 0   ;;  %s2278_s0 = inlined_call_operand.vmem [shape: bf16[2,4,16,32], index: 0, kind: input, shape index: {}]   ;;  %s2279_s1 = inlined_call_operand.vmem [shape: bf16[32,32], index: 1, kind: input, shape index: {}]   ;;  %s2280_s2 = inlined_call_operand.vmem [shape: f32[1,32], index: 2, kind: input, shape index: {}]   ;;  %s2281_s3 = inlined_call_operand.vmem [shape: bf16[9,32,64], index: 3, kind: input, shape index: {}]   ;;  %s2282_s4 = inlined_call_operand.vmem [shape: f32[1,64], index: 4, kind: input, shape index: {}]   ;;  %s2283_s5 = inlined_call_operand.vmem [shape: f32[2,3,3,64], index: 5, kind: output, shape index: {}]  }
   0x1 LB: > { %s1473_s19 = sadd.s32 4294967295, %s1971_s18   ;;  %p1477_p0 = scmp.ge.s32.totalorder %s1971_s18, 1  ;;  %s1971_s18 = sphi %s2003_s18, %s15_s18  }
   0x2   : > { %p187_p1 = scmp.lt.s32.totalorder %s1971_s18, 3 }
   0x4   : > { %p188_p2 = pnand %p1477_p0, %p187_p1 }
   0x5   : > { %p215_p3 = scmp.lt.s32.totalorder (!%p188_p2), %s1473_s19, 1 }
   0x6   : > { %191 = sbr.rel (%p188_p2) target bundleno = 397 (0x18d), region = 40 }
   0xb   : > { %v1885_v0 = vld [vmem:[%s2279_s1 + $0x8] sm:$0xff]  ;;  %v1884_v4 = vld [vmem:[%s2279_s1] sm:$0xff]  ;;  %s2285_s19 = smov (!%p215_p3, %s1473_s19), 1  ;;  %vm253_vm0 = vcmask 261120   ;;  %v1898_v13 = vld [vmem:[%s2281_s3 + $0x18] sm:$0xff]  ;;  %vm770_vm10 = vcmask 518144  }
   0xc   : > { %v1888_v1 = vld [vmem:[%s2279_s1 + $0x8] sm:$0xff]  ;;  %263 = vmatpush.bf16.msra.mxu0 %v1885_v0  ;;  %v1887_v5 = vld [vmem:[%s2279_s1] sm:$0xff]  ;;  %s1882_s11 = sshll.u32 %s2285_s19, 5  ;;  %v1897_v16 = vld [vmem:[%s2281_s3 + $0x10] sm:$0xff]  ;;  %s1949_s20 = smul.u32 12, %s2285_s19 }
   0xd   : > { %v1891_v2 = vld [vmem:[%s2279_s1 + $0x8] sm:$0xff]  ;;  %316 = vmatpush.bf16.msra.mxu1 %v1888_v1  ;;  %v1890_v6 = vld [vmem:[%s2279_s1] sm:$0xff]  ;;  %s219_s14 = scalar_lea.vmem %s2278_s0, %s1882_s11  ;;  %v1902_v18 = vld [vmem:[%s2281_s3 + $0x38] sm:$0xff] }
   0xe   : > { %v1894_v3 = vld [vmem:[%s2279_s1 + $0x8] sm:$0xff]  ;;  %370 = vmatpush.bf16.msra.mxu2 %v1891_v2  ;;  %v1893_v7 = vld [vmem:[%s2279_s1] sm:$0xff]  ;;  %v1889_v10 = vld [vmem:[%s219_s14 + $0x10] sm:$0xff]  ;;  %s2261_s23 = scalar_lea.vmem %s2283_s5, %s1949_s20 }
   0xf   : > { %424 = vmatpush.bf16.msra.mxu3 %v1894_v3  ;;  %v1883_v8 = vld [vmem:[%s219_s14] sm:$0xff]  ;;  %v1886_v9 = vld [vmem:[%s219_s14 + $0x8] sm:$0xff]  ;;  %v1892_v11 = vld [vmem:[%s219_s14 + $0x18] sm:$0xff] }
  0x10   : > { %264 = vmatpush.bf16.msra.mxu0 %v1884_v4  ;;  %v1900_v12 = vld [vmem:[%s2281_s3 + $0x28] sm:$0xff]  ;;  %v1899_v15 = vld [vmem:[%s2281_s3 + $0x20] sm:$0xff]  ;;  %v1901_v19 = vld [vmem:[%s2281_s3 + $0x30] sm:$0xff] }
  0x11   : > { %317 = vmatpush.bf16.msra.mxu1 %v1887_v5  ;;  %v1896_v14 = vld [vmem:[%s2281_s3 + $0x8] sm:$0xff]  ;;  %v1895_v17 = vld [vmem:[%s2281_s3] sm:$0xff]  ;;  %v1906_v22 = vld [vmem:[%s2281_s3 + $0x58] sm:$0xff] }
  0x12   : > { %371 = vmatpush.bf16.msra.mxu2 %v1890_v6  ;;  %v1908_v20 = vld [vmem:[%s2281_s3 + $0x68] sm:$0xff]  ;;  %v1910_v23 = vld [vmem:[%s2281_s3 + $0x78] sm:$0xff]  ;;  %v1907_v24 = vld [vmem:[%s2281_s3 + $0x60] sm:$0xff] }
  0x13   : > { %425 = vmatpush.bf16.msra.mxu3 %v1893_v7  ;;  %1493 = vmatmul.msk.bf16.vlgmr.msra.gmra.mxu0 %vm253_vm0, %v1883_v8  ;;  %v1904_v21 = vld [vmem:[%s2281_s3 + $0x48] sm:$0xff]  ;;  %v1903_v25 = vld [vmem:[%s2281_s3 + $0x40] sm:$0xff]  ;;  %v1905_v26 = vld [vmem:[%s2281_s3 + $0x50] sm:$0xff] }
  0x14   : > { %1508 = vmatmul.msk.bf16.vlgmr.msra.gmra.mxu1 %vm253_vm0, %v1886_v9  ;;  %475 = vmatpush.bf16.msrb.mxu0 %v1898_v13  ;;  %v1958_v27 = vld [vmem:[%s2280_s2] ss:$0 sm:$0xff]  ;;  %v1909_v33 = vld [vmem:[%s2281_s3 + $0x70] sm:$0xff]  ;;  %v1914_v58 = vld [vmem:[%s2281_s3 + $0x8] sm:$0xff] }
  0x15   : > { %1523 = vmatmul.msk.bf16.vlgmr.msra.gmra.mxu2 %vm253_vm0, %v1889_v10  ;;  %503 = vmatpush.bf16.msrb.mxu1 %v1896_v14  ;;  %v1959_v28 = vld [vmem:[%s2280_s2] ss:$0 sm:$0xff]  ;;  %v1912_v62 = vld [vmem:[%s2281_s3 + $0x88] sm:$0xff]  ;;  %v1916_v63 = vld [vmem:[%s2281_s3 + $0x18] sm:$0xff] }
  0x16   : > { %1538 = vmatmul.msk.bf16.vlgmr.msra.gmra.mxu3 %vm253_vm0, %v1892_v11  ;;  %538 = vmatpush.bf16.msrb.mxu2 %v1900_v12  ;;  %v1960_v36 = vld [vmem:[%s2280_s2] ss:$0 sm:$0xff]  ;;  %v1915_v7 = vld [vmem:[%s2281_s3 + $0x10] sm:$0xff]  ;;  %v1918_v13 = vld [vmem:[%s2281_s3 + $0x28] sm:$0xff] }
  0x17   : > { %574 = vmatpush.bf16.msrb.mxu3 %v1902_v18  ;;  %v1961_v37 = vld [vmem:[%s2280_s2] ss:$0 sm:$0xff] }
  0x18   : > { %476 = vmatpush.bf16.msrb.mxu0 %v1897_v16  ;;  %v1913_v5 = vld [vmem:[%s2281_s3] sm:$0xff] }
  0x19   : > { %504 = vmatpush.bf16.msrb.mxu1 %v1895_v17  ;;  %v1911_v6 = vld [vmem:[%s2281_s3 + $0x80] sm:$0xff] }
  0x1a   : > { %539 = vmatpush.bf16.msrb.mxu2 %v1899_v15  ;;  %v1917_v15 = vld [vmem:[%s2281_s3 + $0x20] sm:$0xff] }
  0x1b   : > { %575 = vmatpush.bf16.msrb.mxu3 %v1901_v19 }
  0x1c   : > { %610 = vmatpush.bf16.msra.mxu0 %v1904_v21 }
  0x1d   : > { %646 = vmatpush.bf16.msra.mxu1 %v1906_v22 }
  0x1e   : > { %682 = vmatpush.bf16.msra.mxu2 %v1908_v20  ;;  %v1924_v20 = vld [vmem:[%s2281_s3 + $0x58] sm:$0xff] }
  0x1f   : > { %718 = vmatpush.bf16.msra.mxu3 %v1910_v23  ;;  %v1920_v23 = vld [vmem:[%s2281_s3 + $0x38] sm:$0xff] }
  0x20   : > { %611 = vmatpush.bf16.msra.mxu0 %v1903_v25  ;;  %v1923_v25 = vld [vmem:[%s2281_s3 + $0x50] sm:$0xff] }
  0x21   : > { %647 = vmatpush.bf16.msra.mxu1 %v1905_v26 }
  0x22   : > { %683 = vmatpush.bf16.msra.mxu2 %v1907_v24  ;;  %v1922_v24 = vld [vmem:[%s2281_s3 + $0x48] sm:$0xff] }
  0x23   : > { %719 = vmatpush.bf16.msra.mxu3 %v1909_v33 }
  0x90   : > { %v266_v29 = vpop.f32.mrf.mxu0 }
  0x91   : > { %v319_v30 = vpop.f32.mrf.mxu1  ;;  %v267_v31 = vadd.f32 %v1958_v27, %v266_v29  ;;  %v1926_v29 = vld [vmem:[%s2281_s3 + $0x68] sm:$0xff] }
  0x92   : > { %v320_v32 = vadd.f32 %v1959_v28, %v319_v30 }
  0x93   : > { %vm271_vm1 = vcmp.ge.f32.partialorder %v267_v31, 0.0  ;;  %v273_v34 = vmul.f32 0.01, %v267_v31 }
  0x94   : > { %vm324_vm2 = vcmp.ge.f32.partialorder %v320_v32, 0.0  ;;  %v326_v35 = vmul.f32 0.01, %v320_v32 }
  0x95   : > { %v275_v38 = vsel %vm271_vm1, %v267_v31, %v273_v34  ;;  %v1925_v31 = vld [vmem:[%s2281_s3 + $0x60] sm:$0xff] }
  0x96   : > { %v328_v39 = vsel %vm324_vm2, %v320_v32, %v326_v35  ;;  %277 = vst.msk [vmem:[#allocation2] sm:$0xff] %vm253_vm0, %v275_v38  ;;  %v1934_v35 = vld [vmem:[%s2281_s3 + $0x18] sm:$0xff] }
  0x97   : > { %331 = vst.msk [vmem:[#allocation2 + $0x10] sm:$0xff] %vm253_vm0, %v328_v39  ;;  %v1928_v38 = vld [vmem:[%s2281_s3 + $0x78] sm:$0xff]  ;;  %v1930_v39 = vld [vmem:[%s2281_s3 + $0x88] sm:$0xff] }
  0x98   : > { %v373_v40 = vpop.f32.mrf.mxu2  ;;  %v268_v43 = vpop.f32.mrf.mxu0 }
  0x99   : > { %v427_v41 = vpop.f32.mrf.mxu3  ;;  %v374_v42 = vadd.f32 %v1960_v36, %v373_v40  ;;  %v321_v44 = vpop.f32.mrf.mxu1  ;;  %v269_v46 = vadd.f32 %v1958_v27, %v268_v43  ;;  %v1919_v27 = vld [vmem:[%s2281_s3 + $0x30] sm:$0xff] }
  0x9a   : > { %v428_v45 = vadd.f32 %v1961_v37, %v427_v41  ;;  %v322_v47 = vadd.f32 %v1959_v28, %v321_v44  ;;  %v1921_v28 = vld [vmem:[%s2281_s3 + $0x40] sm:$0xff]  ;;  %v1933_v41 = vld [vmem:[%s2281_s3 + $0x10] sm:$0xff] }
  0x9b   : > { %vm378_vm3 = vcmp.ge.f32.partialorder %v374_v42, 0.0  ;;  %v380_v48 = vmul.f32 0.01, %v374_v42  ;;  %vm272_vm5 = vcmp.ge.f32.partialorder %v269_v46, 0.0  ;;  %v274_v50 = vmul.f32 0.01, %v269_v46 }
  0x9c   : > { %vm432_vm4 = vcmp.ge.f32.partialorder %v428_v45, 0.0  ;;  %v434_v49 = vmul.f32 0.01, %v428_v45  ;;  %vm325_vm6 = vcmp.ge.f32.partialorder %v322_v47, 0.0  ;;  %v327_v51 = vmul.f32 0.01, %v322_v47 }
  0x9d   : > { %v382_v52 = vsel %vm378_vm3, %v374_v42, %v380_v48  ;;  %v276_v53 = vsel %vm272_vm5, %v269_v46, %v274_v50  ;;  %v441_v56 = vld [vmem:[#allocation2] sm:$0x7]  ;;  %v654_v18 = vld [vmem:[#allocation2 + $0x4] sm:$0x7]  ;;  %v1927_v43 = vld [vmem:[%s2281_s3 + $0x70] sm:$0xff] }
  0x9e   : > { %385 = vst.msk [vmem:[#allocation2 + $0x20] sm:$0xff] %vm253_vm0, %v382_v52  ;;  %v329_v54 = vsel %vm325_vm6, %v322_v47, %v327_v51  ;;  %v436_v55 = vsel %vm432_vm4, %v428_v45, %v434_v49  ;;  %v510_v57 = vld [vmem:[#allocation2 + $0x1] sm:$0x7]  ;;  %v447_v59 = vld [vmem:[#allocation2 + $0x10] sm:$0x7]  ;;  %v442_v60 = vpack.c.bf16 %v441_v56, %v441_v56  ;;  %v655_v22 = vpack.c.bf16 %v654_v18, %v654_v18  ;;  %v1932_v45 = vld [vmem:[%s2281_s3 + $0x8] sm:$0xff] }
  0x9f   : > { %278 = vst.msk [vmem:[#allocation2 + $0x8] sm:$0xff] %vm253_vm0, %v276_v53  ;;  %v511_v61 = vpack.c.bf16 %v510_v57, %v510_v57  ;;  %v448_v2 = vpack.c.bf16 %v447_v59, %v447_v59  ;;  %v690_v26 = vld [vmem:[#allocation2 + $0x14] sm:$0x7]  ;;  %v772_v33 = vld [vmem:[#allocation2 + $0x4] sm:$0x7]  ;;  %v1940_v51 = vld [vmem:[%s2281_s3 + $0x48] sm:$0xff] }
  0xa0   : > { %332 = vst.msk [vmem:[#allocation2 + $0x18] sm:$0xff] %vm253_vm0, %v329_v54  ;;  %v375_v0 = vpop.f32.mrf.mxu2  ;;  %1560 = vmatmul.msk.bf16.vlgmr.msrb.gmra.mxu1 %vm253_vm0, %v442_v60  ;;  %v691_v30 = vpack.c.bf16 %v690_v26, %v690_v26  ;;  %v778_v32 = vld [vmem:[#allocation2 + $0x14] sm:$0x7]  ;;  %v726_v34 = vld [vmem:[#allocation2 + $0x5] sm:$0x7]  ;;  %v1936_v54 = vld [vmem:[%s2281_s3 + $0x28] sm:$0xff] }
  0xa1   : > { %v429_v1 = vpop.f32.mrf.mxu3  ;;  %439 = vst.msk [vmem:[#allocation2 + $0x30] sm:$0xff] %vm253_vm0, %v436_v55  ;;  %v376_v3 = vadd.f32 %v1960_v36, %v375_v0  ;;  %1573 = vmatmul.msk.bf16.vlgmr.msrb.gmra.mxu2 %vm253_vm0, %v511_v61  ;;  %1551 = vmatmul.msk.bf16.vlgmr.msrb.gmra.mxu0 %vm253_vm0, %v448_v2  ;;  %v779_v36 = vpack.c.bf16 %v778_v32, %v778_v32  ;;  %v840_v42 = vld [vmem:[#allocation2 + $0x5] sm:$0x7]  ;;  %v1938_v55 = vld [vmem:[%s2281_s3 + $0x38] sm:$0xff]  ;;  %v1937_v60 = vld [vmem:[%s2281_s3 + $0x30] sm:$0xff] }
  0xa2   : > { %v430_v4 = vadd.f32 %v1961_v37, %v429_v1  ;;  %833 = vmatpush.bf16.msrb.mxu2 %v1914_v58  ;;  %754 = vmatpush.bf16.msrb.mxu0 %v1912_v62  ;;  %v773_v37 = vpack.c.bf16 %v772_v33, %v772_v33  ;;  %v727_v40 = vpack.c.bf16 %v726_v34, %v726_v34  ;;  %v1929_v44 = vld [vmem:[%s2281_s3 + $0x80] sm:$0xff]  ;;  %v1942_v61 = vld [vmem:[%s2281_s3 + $0x58] sm:$0xff] }
  0xa3   : > { %vm379_vm7 = vcmp.ge.f32.partialorder %v376_v3, 0.0  ;;  %v381_v8 = vmul.f32 0.01, %v376_v3  ;;  %805 = vmatpush.bf16.msrb.mxu1 %v1916_v63  ;;  %v841_v46 = vpack.c.bf16 %v840_v42, %v840_v42  ;;  %v1931_v47 = vld [vmem:[%s2281_s3] sm:$0xff]  ;;  %v1941_v63 = vld [vmem:[%s2281_s3 + $0x50] sm:$0xff] }
  0xa4   : > { %vm433_vm8 = vcmp.ge.f32.partialorder %v430_v4, 0.0  ;;  %v435_v9 = vmul.f32 0.01, %v430_v4  ;;  %v1939_v57 = vld [vmem:[%s2281_s3 + $0x40] sm:$0xff] }
  0xa5   : > { %v383_v10 = vsel %vm379_vm7, %v376_v3, %v381_v8  ;;  %v546_v12 = vld [vmem:[#allocation2 + $0x20] sm:$0x7]  ;;  %v945_v49 = vld [vmem:[#allocation2 + $0x25] sm:$0x7]  ;;  %v1948_v3 = vld [vmem:[%s2281_s3 + $0x88] sm:$0xff] }
  0xa6   : > { %v437_v11 = vsel %vm433_vm8, %v430_v4, %v435_v9  ;;  %386 = vst.msk [vmem:[#allocation2 + $0x28] sm:$0xff] %vm253_vm0, %v383_v10  ;;  %v547_v14 = vpack.c.bf16 %v546_v12, %v546_v12  ;;  %834 = vmatpush.bf16.msrb.mxu2 %v1913_v5  ;;  %755 = vmatpush.bf16.msrb.mxu0 %v1911_v6  ;;  %v618_v17 = vld [vmem:[#allocation2 + $0x21] sm:$0x7]  ;;  %v875_v50 = vld [vmem:[#allocation2 + $0x24] sm:$0x7]  ;;  %v1944_v6 = vld [vmem:[%s2281_s3 + $0x68] sm:$0xff] }
  0xa7   : > { %440 = vst.msk [vmem:[#allocation2 + $0x38] sm:$0xff] %vm253_vm0, %v437_v11  ;;  %806 = vmatpush.bf16.msrb.mxu1 %v1915_v7  ;;  %v619_v21 = vpack.c.bf16 %v618_v17, %v618_v17  ;;  %v946_v53 = vpack.c.bf16 %v945_v49, %v945_v49  ;;  %v876_v56 = vpack.c.bf16 %v875_v50, %v875_v50  ;;  %v980_v58 = vld [vmem:[#allocation2 + $0x8] sm:$0x7]  ;;  %v1935_v59 = vld [vmem:[%s2281_s3 + $0x20] sm:$0xff]  ;;  %v1101_v1 = vld [vmem:[#allocation2 + $0x18] sm:$0x7] }
  0xa8   : > { %1586 = vmatmul.msk.bf16.vlgmr.msrb.gmra.mxu3 %vm253_vm0, %v547_v14  ;;  %v582_v16 = vld [vmem:[#allocation2 + $0x30] sm:$0x7]  ;;  %v910_v48 = vld [vmem:[#allocation2 + $0x34] sm:$0x7]  ;;  %v981_v62 = vpack.c.bf16 %v980_v58, %v980_v58  ;;  %v1050_v0 = vld [vmem:[#allocation2 + $0x9] sm:$0x7]  ;;  %v1102_v5 = vpack.c.bf16 %v1101_v1, %v1101_v1 }
  0xa9   : > { %867 = vmatpush.bf16.msrb.mxu3 %v1918_v13  ;;  %v583_v19 = vpack.c.bf16 %v582_v16, %v582_v16  ;;  %v911_v52 = vpack.c.bf16 %v910_v48, %v910_v48  ;;  %v1015_v2 = vld [vmem:[#allocation2 + $0x18] sm:$0x7]  ;;  %v1051_v4 = vpack.c.bf16 %v1050_v0, %v1050_v0  ;;  %v1947_v9 = vld [vmem:[%s2281_s3 + $0x80] sm:$0xff]  ;;  %v1095_v10 = vld [vmem:[#allocation2 + $0x8] sm:$0x7] }
  0xaa   : > { %v1946_v7 = vld [vmem:[%s2281_s3 + $0x78] sm:$0xff]  ;;  %v1016_v8 = vpack.c.bf16 %v1015_v2, %v1015_v2  ;;  %v1943_v11 = vld [vmem:[%s2281_s3 + $0x60] sm:$0xff]  ;;  %v1945_v12 = vld [vmem:[%s2281_s3 + $0x70] sm:$0xff]  ;;  %v1096_v13 = vpack.c.bf16 %v1095_v10, %v1095_v10 }
  0xab   : > { %v1163_v16 = vld [vmem:[#allocation2 + $0x9] sm:$0x7]  ;;  %v1962_v50 = vld [vmem:[%s2282_s4] ss:$0 sm:$0xff] }
  0xad   : > { %868 = vmatpush.bf16.msrb.mxu3 %v1917_v15  ;;  %v1198_v14 = vld [vmem:[#allocation2 + $0x28] sm:$0x7] }
  0xae   : > { %v1233_v15 = vld [vmem:[#allocation2 + $0x38] sm:$0x7]  ;;  %v1199_v17 = vpack.c.bf16 %v1198_v14, %v1198_v14 }
  0xaf   : > { %v1234_v18 = vpack.c.bf16 %v1233_v15, %v1233_v15 }
  0xb0   : > { %1612 = vmatmul.msk.bf16.vlgmr.msra.gmra.mxu1 %vm253_vm0, %v619_v21 }
  0xb1   : > { %1625 = vmatmul.msk.bf16.vlgmr.msra.gmra.mxu2 %vm253_vm0, %v655_v22  ;;  %1599 = vmatmul.msk.bf16.vlgmr.msra.gmra.mxu0 %vm253_vm0, %v583_v19  ;;  %v1164_v19 = vpack.c.bf16 %v1163_v16, %v1163_v16  ;;  %v1338_v22 = vld [vmem:[#allocation2 + $0x1c] sm:$0x7]  ;;  %v1963_v16 = vld [vmem:[%s2282_s4] ss:$0 sm:$0xff] }
  0xb2   : > { %972 = vmatpush.bf16.msra.mxu2 %v1924_v20  ;;  %902 = vmatpush.bf16.msra.mxu0 %v1920_v23  ;;  %v1268_v20 = vld [vmem:[#allocation2 + $0x29] sm:$0x7]  ;;  %v1373_v23 = vld [vmem:[#allocation2 + $0xd] sm:$0x7] }
  0xb3   : > { %937 = vmatpush.bf16.msra.mxu1 %v1922_v24  ;;  %v1269_v21 = vpack.c.bf16 %v1268_v20, %v1268_v20  ;;  %v1303_v24 = vld [vmem:[#allocation2 + $0xc] sm:$0x7]  ;;  %v1374_v26 = vpack.c.bf16 %v1373_v23, %v1373_v23 }
  0xb6   : > { %973 = vmatpush.bf16.msra.mxu2 %v1923_v25  ;;  %903 = vmatpush.bf16.msra.mxu0 %v1919_v27  ;;  %v1339_v25 = vpack.c.bf16 %v1338_v22, %v1338_v22  ;;  %v1304_v27 = vpack.c.bf16 %v1303_v24, %v1303_v24 }
  0xb7   : > { %938 = vmatpush.bf16.msra.mxu1 %v1921_v28 }
  0xb8   : > { %1638 = vmatmul.msk.bf16.vlgmr.msra.gmra.mxu3 %vm253_vm0, %v691_v30 }
  0xb9   : > { %1007 = vmatpush.bf16.msra.mxu3 %v1926_v29 }
  0xbd   : > { %1008 = vmatpush.bf16.msra.mxu3 %v1925_v31 }
  0xc0   : > { %1664 = vmatmul.msk.bf16.vlgmr.msrb.gmra.mxu1 %vm253_vm0, %v779_v36 }
  0xc1   : > { %1673 = vmatmul.msk.bf16.vlgmr.msrb.gmra.mxu2 %vm253_vm0, %v773_v37  ;;  %1651 = vmatmul.msk.bf16.vlgmr.msrb.gmra.mxu0 %vm253_vm0, %v727_v40 }
  0xc2   : > { %1128 = vmatpush.bf16.msrb.mxu2 %v1934_v35  ;;  %1042 = vmatpush.bf16.msrb.mxu0 %v1928_v38 }
  0xc3   : > { %1077 = vmatpush.bf16.msrb.mxu1 %v1930_v39 }
  0xc6   : > { %1129 = vmatpush.bf16.msrb.mxu2 %v1933_v41  ;;  %1043 = vmatpush.bf16.msrb.mxu0 %v1927_v43 }
  0xc7   : > { %1078 = vmatpush.bf16.msrb.mxu1 %v1929_v44 }
  0xc8   : > { %1686 = vmatmul.msk.bf16.vlgmr.msrb.gmra.mxu3 %vm253_vm0, %v841_v46 }
  0xc9   : > { %1156 = vmatpush.bf16.msrb.mxu3 %v1932_v45 }
  0xcd   : > { %1157 = vmatpush.bf16.msrb.mxu3 %v1931_v47 }
  0xd0   : > { %1712 = vmatmul.msk.bf16.vlgmr.msra.gmra.mxu1 %vm253_vm0, %v911_v52 }
  0xd1   : > { %1725 = vmatmul.msk.bf16.vlgmr.msra.gmra.mxu2 %vm253_vm0, %v946_v53  ;;  %1699 = vmatmul.msk.bf16.vlgmr.msra.gmra.mxu0 %vm253_vm0, %v876_v56 }
  0xd2   : > { %1260 = vmatpush.bf16.msra.mxu2 %v1940_v51  ;;  %1190 = vmatpush.bf16.msra.mxu0 %v1936_v54 }
  0xd3   : > { %1225 = vmatpush.bf16.msra.mxu1 %v1938_v55 }
  0xd6   : > { %1261 = vmatpush.bf16.msra.mxu2 %v1939_v57  ;;  %1191 = vmatpush.bf16.msra.mxu0 %v1935_v59 }
  0xd7   : > { %1226 = vmatpush.bf16.msra.mxu1 %v1937_v60 }
  0xd8   : > { %1738 = vmatmul.msk.bf16.vlgmr.msra.gmra.mxu3 %vm253_vm0, %v981_v62 }
  0xd9   : > { %1295 = vmatpush.bf16.msra.mxu3 %v1942_v61 }
  0xdd   : > { %1296 = vmatpush.bf16.msra.mxu3 %v1941_v63 }
  0xe0   : > { %1764 = vmatmul.msk.bf16.vlgmr.msrb.gmra.mxu1 %vm253_vm0, %v1051_v4 }
  0xe1   : > { %1778 = vmatmul.msk.bf16.vlgmr.msrb.gmra.mxu2 %vm253_vm0, %v1102_v5  ;;  %1751 = vmatmul.msk.bf16.vlgmr.msrb.gmra.mxu0 %vm253_vm0, %v1016_v8 }
  0xe2   : > { %1400 = vmatpush.bf16.msrb.mxu2 %v1948_v3  ;;  %1330 = vmatpush.bf16.msrb.mxu0 %v1944_v6 }
  0xe3   : > { %1365 = vmatpush.bf16.msrb.mxu1 %v1946_v7 }
  0xe6   : > { %1401 = vmatpush.bf16.msrb.mxu2 %v1947_v9  ;;  %1331 = vmatpush.bf16.msrb.mxu0 %v1943_v11 }
  0xe7   : > { %1366 = vmatpush.bf16.msrb.mxu1 %v1945_v12 }
  0xe8   : > { %1787 = vmatmul.msk.bf16.vlgmr.msrb.gmra.mxu3 %vm253_vm0, %v1096_v13 }
  0xf0   : > { %1813 = vmatmul.msk.bf16.vlgmr.msra.gmra.mxu1 %vm253_vm0, %v1199_v17 }
  0xf1   : > { %1826 = vmatmul.msk.bf16.vlgmr.msra.gmra.mxu2 %vm253_vm0, %v1234_v18  ;;  %1800 = vmatmul.msk.bf16.vlgmr.msra.gmra.mxu0 %vm253_vm0, %v1164_v19 }
  0xf8   : > { %1839 = vmatmul.msk.bf16.vlgmr.msra.gmra.mxu3 %vm253_vm0, %v1269_v21 }
 0x100   : > { %1865 = vmatmul.msk.bf16.vlgmr.msrb.gmra.mxu1 %vm253_vm0, %v1339_v25 }
 0x101   : > { %1878 = vmatmul.msk.bf16.vlgmr.msrb.gmra.mxu2 %vm253_vm0, %v1374_v26  ;;  %1852 = vmatmul.msk.bf16.vlgmr.msrb.gmra.mxu0 %vm253_vm0, %v1304_v27 }
 0x11d   : > { %v506_v28 = vpop.f32.mrf.mxu1 }
 0x11e   : > { %v478_v29 = vpop.f32.mrf.mxu0 }
 0x11f   : > { %v507_v37 = vadd.f32 %v506_v28, %v478_v29 }
 0x124   : > { %v541_v30 = vpop.f32.mrf.mxu2 }
 0x125   : > { %v508_v31 = vpop.f32.mrf.mxu1  ;;  %v545_v38 = vadd.f32 %v541_v30, %v507_v37 }
 0x126   : > { %v480_v32 = vpop.f32.mrf.mxu0 }
 0x12b   : > { %v577_v33 = vpop.f32.mrf.mxu3 }
 0x12c   : > { %v543_v34 = vpop.f32.mrf.mxu2  ;;  %v581_v40 = vadd.f32 %v577_v33, %v545_v38 }
 0x12d   : > { %v649_v35 = vpop.f32.mrf.mxu1 }
 0x12e   : > { %v613_v36 = vpop.f32.mrf.mxu0 }
 0x12f   : > { %v617_v42 = vadd.f32 %v613_v36, %v581_v40 }
 0x131   : > { %v653_v45 = vadd.f32 %v649_v35, %v617_v42 }
 0x133   : > { %v579_v39 = vpop.f32.mrf.mxu3 }
 0x134   : > { %v685_v41 = vpop.f32.mrf.mxu2 }
 0x135   : > { %v651_v43 = vpop.f32.mrf.mxu1  ;;  %v689_v47 = vadd.f32 %v685_v41, %v653_v45  ;;  %v1964_v45 = vld [vmem:[%s2282_s4] ss:$0 sm:$0xff] }
 0x136   : > { %v615_v44 = vpop.f32.mrf.mxu0 }
 0x13b   : > { %v721_v46 = vpop.f32.mrf.mxu3 }
 0x13c   : > { %v687_v48 = vpop.f32.mrf.mxu2  ;;  %v725_v49 = vadd.f32 %v721_v46, %v689_v47 }
 0x13d   : > { %v808_v51 = vpop.f32.mrf.mxu1 }
 0x13e   : > { %v757_v52 = vpop.f32.mrf.mxu0 }
 0x13f   : > { %v761_v53 = vadd.f32 %v757_v52, %v725_v49 }
 0x141   : > { %v766_v54 = vadd.f32 %v1962_v50, %v761_v53 }
 0x143   : > { %v723_v55 = vpop.f32.mrf.mxu3  ;;  %vm767_vm9 = vcmp.ge.f32.partialorder %v766_v54, 0.0  ;;  %v768_v56 = vmul.f32 0.01, %v766_v54 }
 0x144   : > { %v836_v57 = vpop.f32.mrf.mxu2 }
 0x145   : > { %v769_v58 = vsel %vm767_vm9, %v766_v54, %v768_v56  ;;  %v810_v59 = vpop.f32.mrf.mxu1  ;;  %v837_v1 = vadd.f32 %v836_v57, %v808_v51 }
 0x146   : > { %771 = vst.msk [vmem:[%s2261_s23] sm:$0x7] %vm770_vm10, %v769_v58  ;;  %v759_v60 = vpop.f32.mrf.mxu0 }
 0x14b   : > { %v870_v61 = vpop.f32.mrf.mxu3 }
 0x14c   : > { %v838_v62 = vpop.f32.mrf.mxu2  ;;  %v874_v3 = vadd.f32 %v870_v61, %v837_v1 }
 0x14d   : > { %v940_v63 = vpop.f32.mrf.mxu1 }
 0x14e   : > { %v905_v0 = vpop.f32.mrf.mxu0 }
 0x14f   : > { %v909_v5 = vadd.f32 %v905_v0, %v874_v3 }
 0x151   : > { %v944_v8 = vadd.f32 %v940_v63, %v909_v5 }
 0x153   : > { %v872_v2 = vpop.f32.mrf.mxu3 }
 0x154   : > { %v975_v4 = vpop.f32.mrf.mxu2 }
 0x155   : > { %v942_v6 = vpop.f32.mrf.mxu1  ;;  %v979_v10 = vadd.f32 %v975_v4, %v944_v8 }
 0x156   : > { %v907_v7 = vpop.f32.mrf.mxu0 }
 0x15b   : > { %v1010_v9 = vpop.f32.mrf.mxu3 }
 0x15c   : > { %v977_v11 = vpop.f32.mrf.mxu2  ;;  %v1014_v12 = vadd.f32 %v1010_v9, %v979_v10 }
 0x15d   : > { %v1080_v13 = vpop.f32.mrf.mxu1 }
 0x15e   : > { %v1045_v14 = vpop.f32.mrf.mxu0 }
 0x15f   : > { %v1049_v15 = vadd.f32 %v1045_v14, %v1014_v12 }
 0x161   : > { %v1084_v17 = vadd.f32 %v1080_v13, %v1049_v15 }
 0x163   : > { %v1012_v18 = vpop.f32.mrf.mxu3  ;;  %v1089_v19 = vadd.f32 %v1963_v16, %v1084_v17 }
 0x164   : > { %v1131_v20 = vpop.f32.mrf.mxu2 }
 0x165   : > { %vm1090_vm11 = vcmp.ge.f32.partialorder %v1089_v19, 0.0  ;;  %v1091_v21 = vmul.f32 0.01, %v1089_v19  ;;  %v1082_v22 = vpop.f32.mrf.mxu1 }
 0x166   : > { %v1047_v23 = vpop.f32.mrf.mxu0 }
 0x167   : > { %v1092_v24 = vsel %vm1090_vm11, %v1089_v19, %v1091_v21 }
 0x168   : > { %1765 = vst.msk [vmem:[%s2261_s23 + $0x4] sm:$0x7] %vm770_vm10, %v1092_v24 }
 0x16b   : > { %v1159_v25 = vpop.f32.mrf.mxu3 }
 0x16c   : > { %v1133_v26 = vpop.f32.mrf.mxu2  ;;  %v1160_v30 = vadd.f32 %v1159_v25, %v1131_v20 }
 0x16d   : > { %v1228_v27 = vpop.f32.mrf.mxu1 }
 0x16e   : > { %v1193_v28 = vpop.f32.mrf.mxu0 }
 0x16f   : > { %v1197_v32 = vadd.f32 %v1193_v28, %v1160_v30 }
 0x171   : > { %v1232_v35 = vadd.f32 %v1228_v27, %v1197_v32 }
 0x173   : > { %v1161_v29 = vpop.f32.mrf.mxu3 }
 0x174   : > { %v1263_v31 = vpop.f32.mrf.mxu2 }
 0x175   : > { %v1230_v33 = vpop.f32.mrf.mxu1  ;;  %v1267_v37 = vadd.f32 %v1263_v31, %v1232_v35 }
 0x176   : > { %v1195_v34 = vpop.f32.mrf.mxu0 }
 0x17b   : > { %v1298_v36 = vpop.f32.mrf.mxu3 }
 0x17c   : > { %v1265_v38 = vpop.f32.mrf.mxu2  ;;  %v1302_v39 = vadd.f32 %v1298_v36, %v1267_v37 }
 0x17d   : > { %v1368_v40 = vpop.f32.mrf.mxu1 }
 0x17e   : > { %v1333_v41 = vpop.f32.mrf.mxu0 }
 0x17f   : > { %v1337_v42 = vadd.f32 %v1333_v41, %v1302_v39 }
 0x181   : > { %v1372_v43 = vadd.f32 %v1368_v40, %v1337_v42 }
 0x183   : > { %v1300_v44 = vpop.f32.mrf.mxu3 }
 0x184   : > { %v1403_v46 = vpop.f32.mrf.mxu2 }
 0x185   : > { %v1407_v47 = vadd.f32 %v1403_v46, %v1372_v43  ;;  %v1370_v48 = vpop.f32.mrf.mxu1 }
 0x186   : > { %v1335_v50 = vpop.f32.mrf.mxu0 }
 0x187   : > { %v1412_v49 = vadd.f32 %v1964_v45, %v1407_v47 }
 0x189   : > { %vm1413_vm12 = vcmp.ge.f32.partialorder %v1412_v49, 0.0  ;;  %v1414_v51 = vmul.f32 0.01, %v1412_v49 }
 0x18b   : > { %v1415_v52 = vsel %vm1413_vm12, %v1412_v49, %v1414_v51 }
 0x18c   : > { %1879 = vst.msk [vmem:[%s2261_s23 + $0x8] sm:$0x7] %vm770_vm10, %v1415_v52  ;;  %v1405_v53 = vpop.f32.mrf.mxu2 }
 0x18d PF: > { %s15_s18 = sadd.s32 1, %s1971_s18  }
 0x18e   : > { %p12_p4 = scmp.ge.s32.totalorder %s15_s18, 4  }
 0x190   :  { %14 = sbr.rel (!%p12_p4) target bundleno = 1 (0x1), region = 86 }

</bundles_post_ra>
